<compile_context>
chip_gen: v6e
topology: v6e:2x2x1
jax: 0.10.0
libtpu: 0.0.40
codegen_flags: <defaults>
</compile_context>

<pallas_src>
import functools
import math

import jax
import jax.numpy as jnp
from jax import lax
from jax.experimental import pallas as pl
from jax.experimental.pallas import tpu as pltpu

_COMPUTE_DTYPE = jnp.bfloat16  # MXU operand dtype; accumulation stays float32.


def _layer_norm(s, gamma, beta, eps=1e-5):
    # LayerNorm over last dim: biased variance, eps=1e-5 (PyTorch defaults).
    mu = jnp.mean(s, axis=-1, keepdims=True)
    var = jnp.mean((s - mu) ** 2, axis=-1, keepdims=True)
    return (s - mu) * lax.rsqrt(var + eps) * gamma + beta


def _encoder_layer_kernel(
    # inputs
    x_ref, wqkv_ref, bqkv_ref, wo_ref, bo_ref,
    ln1g_ref, ln1b_ref, w1_ref, b1_ref, w2_ref, b2_ref,
    ln2g_ref, ln2b_ref,
    # outputs
    o_ref, attn_ref,
    *, n_heads, activation,
):
    Bblk, L, D = x_ref.shape
    H = n_heads
    dh = D // H
    rows = Bblk * L

    # Residual path kept in f32; matmul operands fed to the MXU in bf16.
    x2d = x_ref[...].reshape(rows, D).astype(jnp.float32)           # [rows, D]
    x_mm = x2d.astype(_COMPUTE_DTYPE)

    # ---- fused QKV projection: one [rows, D] @ [D, 3D] matmul ---------------
    qkv = jnp.dot(x_mm, wqkv_ref[...],
                  preferred_element_type=jnp.float32) + bqkv_ref[...]  # [rows, 3D] f32

    # ---- per-(batch, head) scaled dot-product attention ---------------------
    # TODO(synk): at large L / H switch to lax.fori_loop(..., unroll=small) or an
    # extra "arbitrary" grid axis to bound vreg live ranges (fine at these sizes).
    scale = 1.0 / math.sqrt(dh)
    ctx_rows = []
    for b in range(Bblk):
        qkv_b = qkv[b * L:(b + 1) * L]                               # [L, 3D]
        head_ctx = []
        for h in range(H):
            qh = qkv_b[:, h * dh:(h + 1) * dh]                       # [L, dh]
            kh = qkv_b[:, D + h * dh:D + (h + 1) * dh]               # [L, dh]
            vh = qkv_b[:, 2 * D + h * dh:2 * D + (h + 1) * dh]       # [L, dh]

            # q @ k^T without materializing a transpose of k.
            s = lax.dot_general(
                qh.astype(_COMPUTE_DTYPE), kh.astype(_COMPUTE_DTYPE),
                (((1,), (1,)), ((), ())),
                preferred_element_type=jnp.float32) * scale          # [L, L]
            s = s - jnp.max(s, axis=-1, keepdims=True)
            e = jnp.exp(s)
            p = e * pl.reciprocal(jnp.sum(e, axis=-1, keepdims=True), approx=True)

            attn_ref[b, h] = p.astype(attn_ref.dtype)                # [L, L]
            head_ctx.append(jnp.dot(p.astype(_COMPUTE_DTYPE),
                                    vh.astype(_COMPUTE_DTYPE),
                                    preferred_element_type=jnp.float32))
        ctx_rows.append(jnp.concatenate(head_ctx, axis=-1))          # [L, D]
    ctx = jnp.concatenate(ctx_rows, axis=0)                          # [rows, D], in vregs

    # ---- output projection + add & LayerNorm1 epilogue ----------------------
    new_x = jnp.dot(ctx.astype(_COMPUTE_DTYPE), wo_ref[...],
                    preferred_element_type=jnp.float32) + bo_ref[...]
    x1 = _layer_norm(x2d + new_x, ln1g_ref[...], ln1b_ref[...])      # [rows, D]

    # ---- FFN: conv1 (1x1) -> activation -> conv2 (1x1) ----------------------
    hid = jnp.dot(x1.astype(_COMPUTE_DTYPE), w1_ref[...],
                  preferred_element_type=jnp.float32) + b1_ref[...]  # [rows, d_ff]
    if activation == "relu":
        hid = jnp.maximum(hid, 0.0)
    else:
        hid = jax.nn.gelu(hid, approximate=False)
    y = jnp.dot(hid.astype(_COMPUTE_DTYPE), w2_ref[...],
                preferred_element_type=jnp.float32) + b2_ref[...]    # [rows, D]

    # ---- add & LayerNorm2 epilogue ------------------------------------------
    out = _layer_norm(x1 + y, ln2g_ref[...], ln2b_ref[...])          # [rows, D]
    o_ref[...] = out.reshape(Bblk, L, D).astype(o_ref.dtype)


def _pick_block_b(batch, seq_len, target_rows=256):
    """Largest divisor of `batch` keeping Bblk*L near target_rows; prefer >=2
    grid steps (megacore) when that still leaves >=128 rows per step."""
    divisors = [d for d in range(1, batch + 1) if batch % d == 0]
    fitting = [d for d in divisors if d * seq_len <= max(target_rows, seq_len)]
    best = max(fitting) if fitting else 1
    if best == batch and batch > 1:
        smaller = [d for d in divisors if d < batch and d * seq_len >= 128]
        if smaller:
            best = max(smaller)
    return best


def prepare_params(params, compute_dtype=_COMPUTE_DTYPE):
    """Fuse Q/K/V weights and cast matmul weights to bf16 ONCE (outside the
    per-call path). Biases / LayerNorm params stay f32."""
    D = params["wq"].shape[0]
    d_ff = params["w1"].shape[1]
    f32 = jnp.float32
    return {
        "wqkv": jnp.concatenate([params["wq"], params["wk"], params["wv"]],
                                axis=1).astype(compute_dtype),         # [D, 3D]
        "bqkv": jnp.concatenate([params["bq"], params["bk"], params["bv"]]
                                ).reshape(1, 3 * D).astype(f32),
        "wo": params["wo"].astype(compute_dtype),
        "bo": params["bo"].reshape(1, D).astype(f32),
        "ln1_g": params["ln1_g"].reshape(1, D).astype(f32),
        "ln1_b": params["ln1_b"].reshape(1, D).astype(f32),
        "w1": params["w1"].astype(compute_dtype),
        "b1": params["b1"].reshape(1, d_ff).astype(f32),
        "w2": params["w2"].astype(compute_dtype),
        "b2": params["b2"].reshape(1, D).astype(f32),
        "ln2_g": params["ln2_g"].reshape(1, D).astype(f32),
        "ln2_b": params["ln2_b"].reshape(1, D).astype(f32),
    }


@functools.partial(jax.jit, static_argnames=("n_heads", "activation"))
def encoder_layer_forward(x, prepared, n_heads, activation="relu"):
    """x: [B, L, D] -> (out [B, L, D], attn [B, H, L, L])."""
    B, L, D = x.shape
    H = n_heads
    d_ff = prepared["w1"].shape[1]

    bblk = _pick_block_b(B, L)
    grid = (B // bblk,)

    def resident(shape):
        # Full-array block, same tile every grid step (weights stay in VMEM).
        ndim = len(shape)
        return pl.BlockSpec(shape, lambda g, _n=ndim: (0,) * _n)

    xspec = pl.BlockSpec((bblk, L, D), lambda g: (g, 0, 0))
    attn_spec = pl.BlockSpec((bblk, H, L, L), lambda g: (g, 0, 0, 0))

    # VMEM budget: weights (double-buffered by the pipeline), in/out blocks
    # (double-buffered), plus the in-kernel f32 intermediates. Capped at 64 MiB
    # so the same limit is safe on v7x.
    weight_bytes = sum(int(v.size) * v.dtype.itemsize for v in prepared.values())
    act_bytes = (2 * (2 * bblk * L * D * x.dtype.itemsize + bblk * H * L * L * 4)
                 + bblk * L * (3 * D + d_ff + 4 * D) * 4)
    vmem_limit = int(min(max(2 * weight_bytes + act_bytes + (8 << 20), 32 << 20),
                         64 << 20))

    kernel = functools.partial(_encoder_layer_kernel, n_heads=H,
                               activation=activation)

    out, attn = pl.pallas_call(
        kernel,
        grid=grid,
        in_specs=[
            xspec,
            resident((D, 3 * D)), resident((1, 3 * D)),        # wqkv, bqkv
            resident((D, D)), resident((1, D)),                # wo, bo
            resident((1, D)), resident((1, D)),                # ln1 gamma/beta
            resident((D, d_ff)), resident((1, d_ff)),          # w1, b1
            resident((d_ff, D)), resident((1, D)),             # w2, b2
            resident((1, D)), resident((1, D)),                # ln2 gamma/beta
        ],
        out_specs=(xspec, attn_spec),
        out_shape=(
            jax.ShapeDtypeStruct((B, L, D), x.dtype),
            jax.ShapeDtypeStruct((B, H, L, L), jnp.float32),
        ),
        compiler_params=pltpu.CompilerParams(
            dimension_semantics=("parallel",),
            vmem_limit_bytes=vmem_limit,
        ),
    )(
        x,
        prepared["wqkv"], prepared["bqkv"],
        prepared["wo"], prepared["bo"],
        prepared["ln1_g"], prepared["ln1_b"],
        prepared["w1"], prepared["b1"],
        prepared["w2"], prepared["b2"],
        prepared["ln2_g"], prepared["ln2_b"],
    )
    return out, attn


def init_params(key, d_model, d_ff, dtype=jnp.float32):
    ks = jax.random.split(key, 8)
    scale = 0.05

    def w(k, shape):
        return (scale * jax.random.normal(k, shape)).astype(dtype)

    return {
        "wq": w(ks[0], (d_model, d_model)), "bq": jnp.zeros((d_model,), dtype),
        "wk": w(ks[1], (d_model, d_model)), "bk": jnp.zeros((d_model,), dtype),
        "wv": w(ks[2], (d_model, d_model)), "bv": jnp.zeros((d_model,), dtype),
        "wo": w(ks[3], (d_model, d_model)), "bo": jnp.zeros((d_model,), dtype),
        # conv1: d_model -> d_ff (1x1), conv2: d_ff -> d_model (1x1)
        "w1": w(ks[4], (d_model, d_ff)),    "b1": w(ks[5], (d_ff,)),
        "w2": w(ks[6], (d_ff, d_model)),    "b2": w(ks[7], (d_model,)),
        # LayerNorm params (torch default init)
        "ln1_g": jnp.ones((d_model,), dtype), "ln1_b": jnp.zeros((d_model,), dtype),
        "ln2_g": jnp.ones((d_model,), dtype), "ln2_b": jnp.zeros((d_model,), dtype),
    }


if __name__ == "__main__":
    B, L, d_model, n_heads = 2, 8, 32, 4
    d_ff = 2 * d_model  # 64

    key = jax.random.PRNGKey(0)
    kx, kp = jax.random.split(key)
    x = jax.random.normal(kx, (B, L, d_model), dtype=jnp.float32)
    params = init_params(kp, d_model, d_ff)

    # One-time fusion/cast of parameters (kept out of the per-call hot path).
    prepared = prepare_params(params)

    out, attn = encoder_layer_forward(x, prepared, n_heads)
    jax.block_until_ready((out, attn))

    assert out.shape == (B, L, d_model)
    assert attn.shape == (B, n_heads, L, L)
    print("KERNEL_OK")
</pallas_src>

<mosaic_0001>
module attributes {stable_mosaic.version = 11 : i64} {
  func.func @_encoder_layer_kernel(%arg0: i32, %arg1: memref<2x8x32xf32, #tpu.memory_space<vmem>>, %arg2: memref<32x96xbf16, #tpu.memory_space<vmem>>, %arg3: memref<1x96xf32, #tpu.memory_space<vmem>>, %arg4: memref<32x32xbf16, #tpu.memory_space<vmem>>, %arg5: memref<1x32xf32, #tpu.memory_space<vmem>>, %arg6: memref<1x32xf32, #tpu.memory_space<vmem>>, %arg7: memref<1x32xf32, #tpu.memory_space<vmem>>, %arg8: memref<32x64xbf16, #tpu.memory_space<vmem>>, %arg9: memref<1x64xf32, #tpu.memory_space<vmem>>, %arg10: memref<64x32xbf16, #tpu.memory_space<vmem>>, %arg11: memref<1x32xf32, #tpu.memory_space<vmem>>, %arg12: memref<1x32xf32, #tpu.memory_space<vmem>>, %arg13: memref<1x32xf32, #tpu.memory_space<vmem>>, %arg14: memref<2x8x32xf32, #tpu.memory_space<vmem>>, %arg15: memref<2x4x8x8xf32, #tpu.memory_space<vmem>>) attributes {dimension_semantics = [#tpu.dimension_semantics<parallel>], iteration_bounds = array<i64: 1>, scalar_prefetch = 0 : i64, scratch_operands = 0 : i64, tpu.core_type = #tpu.core_type<tc>, window_params = [{transform_indices = @transform_0, window_bounds = array<i64: 2, 8, 32>}, {pipeline_mode = #tpu.pipeline_mode<synchronous>, transform_indices = @transform_1, window_bounds = array<i64: 32, 96>}, {pipeline_mode = #tpu.pipeline_mode<synchronous>, transform_indices = @transform_2, window_bounds = array<i64: 1, 96>}, {pipeline_mode = #tpu.pipeline_mode<synchronous>, transform_indices = @transform_3, window_bounds = array<i64: 32, 32>}, {pipeline_mode = #tpu.pipeline_mode<synchronous>, transform_indices = @transform_4, window_bounds = array<i64: 1, 32>}, {pipeline_mode = #tpu.pipeline_mode<synchronous>, transform_indices = @transform_5, window_bounds = array<i64: 1, 32>}, {pipeline_mode = #tpu.pipeline_mode<synchronous>, transform_indices = @transform_6, window_bounds = array<i64: 1, 32>}, {pipeline_mode = #tpu.pipeline_mode<synchronous>, transform_indices = @transform_7, window_bounds = array<i64: 32, 64>}, {pipeline_mode = #tpu.pipeline_mode<synchronous>, transform_indices = @transform_8, window_bounds = array<i64: 1, 64>}, {pipeline_mode = #tpu.pipeline_mode<synchronous>, transform_indices = @transform_9, window_bounds = array<i64: 64, 32>}, {pipeline_mode = #tpu.pipeline_mode<synchronous>, transform_indices = @transform_10, window_bounds = array<i64: 1, 32>}, {pipeline_mode = #tpu.pipeline_mode<synchronous>, transform_indices = @transform_11, window_bounds = array<i64: 1, 32>}, {pipeline_mode = #tpu.pipeline_mode<synchronous>, transform_indices = @transform_12, window_bounds = array<i64: 1, 32>}, {transform_indices = @transform_13, window_bounds = array<i64: 2, 8, 32>}, {transform_indices = @transform_14, window_bounds = array<i64: 2, 4, 8, 8>}]} {
    %c0 = arith.constant 0 : index
    %c0_0 = arith.constant 0 : index
    %c0_1 = arith.constant 0 : index
    %0 = vector.load %arg1[%c0, %c0_0, %c0_1] : memref<2x8x32xf32, #tpu.memory_space<vmem>>, vector<2x8x32xf32>
    %1 = vector.shape_cast %0 : vector<2x8x32xf32> to vector<16x32xf32>
    %2 = arith.truncf %1 : vector<16x32xf32> to vector<16x32xbf16>
    %c0_2 = arith.constant 0 : index
    %c0_3 = arith.constant 0 : index
    %3 = vector.load %arg2[%c0_2, %c0_3] : memref<32x96xbf16, #tpu.memory_space<vmem>>, vector<32x96xbf16>
    %cst = arith.constant dense<0.000000e+00> : vector<16x96xf32>
    %4 = tpu.matmul %2, %3, %cst {dimension_numbers = #tpu.dot_dimension_numbers<[1], [0], [0], [1], [0, 0, 1, 1], [], []>} : vector<16x32xbf16>, vector<32x96xbf16>, vector<16x96xf32> -> vector<16x96xf32>
    %c0_4 = arith.constant 0 : index
    %c0_5 = arith.constant 0 : index
    %5 = vector.load %arg3[%c0_4, %c0_5] : memref<1x96xf32, #tpu.memory_space<vmem>>, vector<1x96xf32>
    %6 = vector.broadcast %5 : vector<1x96xf32> to vector<16x96xf32>
    %7 = arith.addf %4, %6 : vector<16x96xf32>
    %8 = vector.extract_strided_slice %7 {offsets = [0, 0], sizes = [8, 96], strides = [1, 1]} : vector<16x96xf32> to vector<8x96xf32>
    %9 = vector.extract_strided_slice %8 {offsets = [0, 0], sizes = [8, 8], strides = [1, 1]} : vector<8x96xf32> to vector<8x8xf32>
    %10 = vector.extract_strided_slice %8 {offsets = [0, 32], sizes = [8, 8], strides = [1, 1]} : vector<8x96xf32> to vector<8x8xf32>
    %11 = vector.extract_strided_slice %8 {offsets = [0, 64], sizes = [8, 8], strides = [1, 1]} : vector<8x96xf32> to vector<8x8xf32>
    %12 = arith.truncf %9 : vector<8x8xf32> to vector<8x8xbf16>
    %13 = arith.truncf %10 : vector<8x8xf32> to vector<8x8xbf16>
    %cst_6 = arith.constant dense<0.000000e+00> : vector<8x8xf32>
    %14 = tpu.matmul %12, %13, %cst_6 {dimension_numbers = #tpu.dot_dimension_numbers<[1], [1], [0], [0], [0, 0, 1, 0], [], []>} : vector<8x8xbf16>, vector<8x8xbf16>, vector<8x8xf32> -> vector<8x8xf32>
    %cst_7 = arith.constant 0.353553385 : f32
    %15 = vector.broadcast %cst_7 : f32 to vector<8x8xf32>
    %16 = arith.mulf %14, %15 : vector<8x8xf32>
    %cst_8 = arith.constant dense<0xFF800000> : vector<8xf32>
    %17 = vector.multi_reduction <maximumf>, %16, %cst_8 [1] : vector<8x8xf32> to vector<8xf32>
    %18 = vector.shape_cast %17 : vector<8xf32> to vector<8x1xf32>
    %19 = vector.broadcast %18 : vector<8x1xf32> to vector<8x8xf32>
    %20 = arith.subf %16, %19 : vector<8x8xf32>
    %21 = math.exp %20 : vector<8x8xf32>
    %cst_9 = arith.constant dense<0.000000e+00> : vector<8xf32>
    %22 = vector.multi_reduction <add>, %21, %cst_9 [1] : vector<8x8xf32> to vector<8xf32>
    %23 = vector.shape_cast %22 : vector<8xf32> to vector<8x1xf32>
    %24 = tpu.reciprocal %23 {approx = true} : vector<8x1xf32> -> vector<8x1xf32>
    %25 = vector.broadcast %24 : vector<8x1xf32> to vector<8x8xf32>
    %26 = arith.mulf %21, %25 : vector<8x8xf32>
    %c0_10 = arith.constant 0 : index
    %c0_11 = arith.constant 0 : index
    %c0_12 = arith.constant 0 : index
    %c0_13 = arith.constant 0 : index
    %27 = vector.load %arg15[%c0_10, %c0_11, %c0_12, %c0_13] : memref<2x4x8x8xf32, #tpu.memory_space<vmem>>, vector<1x1x8x8xf32>
    %28 = vector.shape_cast %27 : vector<1x1x8x8xf32> to vector<8x8xf32>
    %29 = vector.shape_cast %26 : vector<8x8xf32> to vector<1x1x8x8xf32>
    tpu.vector_store %arg15[%c0_10, %c0_11, %c0_12, %c0_13], %29 {strides = array<i32>} : memref<2x4x8x8xf32, #tpu.memory_space<vmem>>, vector<1x1x8x8xf32>,
    %30 = arith.truncf %26 : vector<8x8xf32> to vector<8x8xbf16>
    %31 = arith.truncf %11 : vector<8x8xf32> to vector<8x8xbf16>
    %cst_14 = arith.constant dense<0.000000e+00> : vector<8x8xf32>
    %32 = tpu.matmul %30, %31, %cst_14 {dimension_numbers = #tpu.dot_dimension_numbers<[1], [0], [0], [1], [0, 0, 1, 1], [], []>} : vector<8x8xbf16>, vector<8x8xbf16>, vector<8x8xf32> -> vector<8x8xf32>
    %33 = vector.extract_strided_slice %8 {offsets = [0, 8], sizes = [8, 8], strides = [1, 1]} : vector<8x96xf32> to vector<8x8xf32>
    %34 = vector.extract_strided_slice %8 {offsets = [0, 40], sizes = [8, 8], strides = [1, 1]} : vector<8x96xf32> to vector<8x8xf32>
    %35 = vector.extract_strided_slice %8 {offsets = [0, 72], sizes = [8, 8], strides = [1, 1]} : vector<8x96xf32> to vector<8x8xf32>
    %36 = arith.truncf %33 : vector<8x8xf32> to vector<8x8xbf16>
    %37 = arith.truncf %34 : vector<8x8xf32> to vector<8x8xbf16>
    %cst_15 = arith.constant dense<0.000000e+00> : vector<8x8xf32>
    %38 = tpu.matmul %36, %37, %cst_15 {dimension_numbers = #tpu.dot_dimension_numbers<[1], [1], [0], [0], [0, 0, 1, 0], [], []>} : vector<8x8xbf16>, vector<8x8xbf16>, vector<8x8xf32> -> vector<8x8xf32>
    %cst_16 = arith.constant 0.353553385 : f32
    %39 = vector.broadcast %cst_16 : f32 to vector<8x8xf32>
    %40 = arith.mulf %38, %39 : vector<8x8xf32>
    %cst_17 = arith.constant dense<0xFF800000> : vector<8xf32>
    %41 = vector.multi_reduction <maximumf>, %40, %cst_17 [1] : vector<8x8xf32> to vector<8xf32>
    %42 = vector.shape_cast %41 : vector<8xf32> to vector<8x1xf32>
    %43 = vector.broadcast %42 : vector<8x1xf32> to vector<8x8xf32>
    %44 = arith.subf %40, %43 : vector<8x8xf32>
    %45 = math.exp %44 : vector<8x8xf32>
    %cst_18 = arith.constant dense<0.000000e+00> : vector<8xf32>
    %46 = vector.multi_reduction <add>, %45, %cst_18 [1] : vector<8x8xf32> to vector<8xf32>
    %47 = vector.shape_cast %46 : vector<8xf32> to vector<8x1xf32>
    %48 = tpu.reciprocal %47 {approx = true} : vector<8x1xf32> -> vector<8x1xf32>
    %49 = vector.broadcast %48 : vector<8x1xf32> to vector<8x8xf32>
    %50 = arith.mulf %45, %49 : vector<8x8xf32>
    %c0_19 = arith.constant 0 : index
    %c1 = arith.constant 1 : index
    %c0_20 = arith.constant 0 : index
    %c0_21 = arith.constant 0 : index
    %51 = vector.load %arg15[%c0_19, %c1, %c0_20, %c0_21] : memref<2x4x8x8xf32, #tpu.memory_space<vmem>>, vector<1x1x8x8xf32>
    %52 = vector.shape_cast %51 : vector<1x1x8x8xf32> to vector<8x8xf32>
    %53 = vector.shape_cast %50 : vector<8x8xf32> to vector<1x1x8x8xf32>
    tpu.vector_store %arg15[%c0_19, %c1, %c0_20, %c0_21], %53 {strides = array<i32>} : memref<2x4x8x8xf32, #tpu.memory_space<vmem>>, vector<1x1x8x8xf32>,
    %54 = arith.truncf %50 : vector<8x8xf32> to vector<8x8xbf16>
    %55 = arith.truncf %35 : vector<8x8xf32> to vector<8x8xbf16>
    %cst_22 = arith.constant dense<0.000000e+00> : vector<8x8xf32>
    %56 = tpu.matmul %54, %55, %cst_22 {dimension_numbers = #tpu.dot_dimension_numbers<[1], [0], [0], [1], [0, 0, 1, 1], [], []>} : vector<8x8xbf16>, vector<8x8xbf16>, vector<8x8xf32> -> vector<8x8xf32>
    %57 = vector.extract_strided_slice %8 {offsets = [0, 16], sizes = [8, 8], strides = [1, 1]} : vector<8x96xf32> to vector<8x8xf32>
    %58 = vector.extract_strided_slice %8 {offsets = [0, 48], sizes = [8, 8], strides = [1, 1]} : vector<8x96xf32> to vector<8x8xf32>
    %59 = vector.extract_strided_slice %8 {offsets = [0, 80], sizes = [8, 8], strides = [1, 1]} : vector<8x96xf32> to vector<8x8xf32>
    %60 = arith.truncf %57 : vector<8x8xf32> to vector<8x8xbf16>
    %61 = arith.truncf %58 : vector<8x8xf32> to vector<8x8xbf16>
    %cst_23 = arith.constant dense<0.000000e+00> : vector<8x8xf32>
    %62 = tpu.matmul %60, %61, %cst_23 {dimension_numbers = #tpu.dot_dimension_numbers<[1], [1], [0], [0], [0, 0, 1, 0], [], []>} : vector<8x8xbf16>, vector<8x8xbf16>, vector<8x8xf32> -> vector<8x8xf32>
    %cst_24 = arith.constant 0.353553385 : f32
    %63 = vector.broadcast %cst_24 : f32 to vector<8x8xf32>
    %64 = arith.mulf %62, %63 : vector<8x8xf32>
    %cst_25 = arith.constant dense<0xFF800000> : vector<8xf32>
    %65 = vector.multi_reduction <maximumf>, %64, %cst_25 [1] : vector<8x8xf32> to vector<8xf32>
    %66 = vector.shape_cast %65 : vector<8xf32> to vector<8x1xf32>
    %67 = vector.broadcast %66 : vector<8x1xf32> to vector<8x8xf32>
    %68 = arith.subf %64, %67 : vector<8x8xf32>
    %69 = math.exp %68 : vector<8x8xf32>
    %cst_26 = arith.constant dense<0.000000e+00> : vector<8xf32>
    %70 = vector.multi_reduction <add>, %69, %cst_26 [1] : vector<8x8xf32> to vector<8xf32>
    %71 = vector.shape_cast %70 : vector<8xf32> to vector<8x1xf32>
    %72 = tpu.reciprocal %71 {approx = true} : vector<8x1xf32> -> vector<8x1xf32>
    %73 = vector.broadcast %72 : vector<8x1xf32> to vector<8x8xf32>
    %74 = arith.mulf %69, %73 : vector<8x8xf32>
    %c0_27 = arith.constant 0 : index
    %c2 = arith.constant 2 : index
    %c0_28 = arith.constant 0 : index
    %c0_29 = arith.constant 0 : index
    %75 = vector.load %arg15[%c0_27, %c2, %c0_28, %c0_29] : memref<2x4x8x8xf32, #tpu.memory_space<vmem>>, vector<1x1x8x8xf32>
    %76 = vector.shape_cast %75 : vector<1x1x8x8xf32> to vector<8x8xf32>
    %77 = vector.shape_cast %74 : vector<8x8xf32> to vector<1x1x8x8xf32>
    tpu.vector_store %arg15[%c0_27, %c2, %c0_28, %c0_29], %77 {strides = array<i32>} : memref<2x4x8x8xf32, #tpu.memory_space<vmem>>, vector<1x1x8x8xf32>,
    %78 = arith.truncf %74 : vector<8x8xf32> to vector<8x8xbf16>
    %79 = arith.truncf %59 : vector<8x8xf32> to vector<8x8xbf16>
    %cst_30 = arith.constant dense<0.000000e+00> : vector<8x8xf32>
    %80 = tpu.matmul %78, %79, %cst_30 {dimension_numbers = #tpu.dot_dimension_numbers<[1], [0], [0], [1], [0, 0, 1, 1], [], []>} : vector<8x8xbf16>, vector<8x8xbf16>, vector<8x8xf32> -> vector<8x8xf32>
    %81 = vector.extract_strided_slice %8 {offsets = [0, 24], sizes = [8, 8], strides = [1, 1]} : vector<8x96xf32> to vector<8x8xf32>
    %82 = vector.extract_strided_slice %8 {offsets = [0, 56], sizes = [8, 8], strides = [1, 1]} : vector<8x96xf32> to vector<8x8xf32>
    %83 = vector.extract_strided_slice %8 {offsets = [0, 88], sizes = [8, 8], strides = [1, 1]} : vector<8x96xf32> to vector<8x8xf32>
    %84 = arith.truncf %81 : vector<8x8xf32> to vector<8x8xbf16>
    %85 = arith.truncf %82 : vector<8x8xf32> to vector<8x8xbf16>
    %cst_31 = arith.constant dense<0.000000e+00> : vector<8x8xf32>
    %86 = tpu.matmul %84, %85, %cst_31 {dimension_numbers = #tpu.dot_dimension_numbers<[1], [1], [0], [0], [0, 0, 1, 0], [], []>} : vector<8x8xbf16>, vector<8x8xbf16>, vector<8x8xf32> -> vector<8x8xf32>
    %cst_32 = arith.constant 0.353553385 : f32
    %87 = vector.broadcast %cst_32 : f32 to vector<8x8xf32>
    %88 = arith.mulf %86, %87 : vector<8x8xf32>
    %cst_33 = arith.constant dense<0xFF800000> : vector<8xf32>
    %89 = vector.multi_reduction <maximumf>, %88, %cst_33 [1] : vector<8x8xf32> to vector<8xf32>
    %90 = vector.shape_cast %89 : vector<8xf32> to vector<8x1xf32>
    %91 = vector.broadcast %90 : vector<8x1xf32> to vector<8x8xf32>
    %92 = arith.subf %88, %91 : vector<8x8xf32>
    %93 = math.exp %92 : vector<8x8xf32>
    %cst_34 = arith.constant dense<0.000000e+00> : vector<8xf32>
    %94 = vector.multi_reduction <add>, %93, %cst_34 [1] : vector<8x8xf32> to vector<8xf32>
    %95 = vector.shape_cast %94 : vector<8xf32> to vector<8x1xf32>
    %96 = tpu.reciprocal %95 {approx = true} : vector<8x1xf32> -> vector<8x1xf32>
    %97 = vector.broadcast %96 : vector<8x1xf32> to vector<8x8xf32>
    %98 = arith.mulf %93, %97 : vector<8x8xf32>
    %c0_35 = arith.constant 0 : index
    %c3 = arith.constant 3 : index
    %c0_36 = arith.constant 0 : index
    %c0_37 = arith.constant 0 : index
    %99 = vector.load %arg15[%c0_35, %c3, %c0_36, %c0_37] : memref<2x4x8x8xf32, #tpu.memory_space<vmem>>, vector<1x1x8x8xf32>
    %100 = vector.shape_cast %99 : vector<1x1x8x8xf32> to vector<8x8xf32>
    %101 = vector.shape_cast %98 : vector<8x8xf32> to vector<1x1x8x8xf32>
    tpu.vector_store %arg15[%c0_35, %c3, %c0_36, %c0_37], %101 {strides = array<i32>} : memref<2x4x8x8xf32, #tpu.memory_space<vmem>>, vector<1x1x8x8xf32>,
    %102 = arith.truncf %98 : vector<8x8xf32> to vector<8x8xbf16>
    %103 = arith.truncf %83 : vector<8x8xf32> to vector<8x8xbf16>
    %cst_38 = arith.constant dense<0.000000e+00> : vector<8x8xf32>
    %104 = tpu.matmul %102, %103, %cst_38 {dimension_numbers = #tpu.dot_dimension_numbers<[1], [0], [0], [1], [0, 0, 1, 1], [], []>} : vector<8x8xbf16>, vector<8x8xbf16>, vector<8x8xf32> -> vector<8x8xf32>
    %105 = tpu.concatenate %32, %56, %80, %104 in 1 : vector<8x8xf32>, vector<8x8xf32>, vector<8x8xf32>, vector<8x8xf32> -> vector<8x32xf32>
    %106 = vector.extract_strided_slice %7 {offsets = [8, 0], sizes = [8, 96], strides = [1, 1]} : vector<16x96xf32> to vector<8x96xf32>
    %107 = vector.extract_strided_slice %106 {offsets = [0, 0], sizes = [8, 8], strides = [1, 1]} : vector<8x96xf32> to vector<8x8xf32>
    %108 = vector.extract_strided_slice %106 {offsets = [0, 32], sizes = [8, 8], strides = [1, 1]} : vector<8x96xf32> to vector<8x8xf32>
    %109 = vector.extract_strided_slice %106 {offsets = [0, 64], sizes = [8, 8], strides = [1, 1]} : vector<8x96xf32> to vector<8x8xf32>
    %110 = arith.truncf %107 : vector<8x8xf32> to vector<8x8xbf16>
    %111 = arith.truncf %108 : vector<8x8xf32> to vector<8x8xbf16>
    %cst_39 = arith.constant dense<0.000000e+00> : vector<8x8xf32>
    %112 = tpu.matmul %110, %111, %cst_39 {dimension_numbers = #tpu.dot_dimension_numbers<[1], [1], [0], [0], [0, 0, 1, 0], [], []>} : vector<8x8xbf16>, vector<8x8xbf16>, vector<8x8xf32> -> vector<8x8xf32>
    %cst_40 = arith.constant 0.353553385 : f32
    %113 = vector.broadcast %cst_40 : f32 to vector<8x8xf32>
    %114 = arith.mulf %112, %113 : vector<8x8xf32>
    %cst_41 = arith.constant dense<0xFF800000> : vector<8xf32>
    %115 = vector.multi_reduction <maximumf>, %114, %cst_41 [1] : vector<8x8xf32> to vector<8xf32>
    %116 = vector.shape_cast %115 : vector<8xf32> to vector<8x1xf32>
    %117 = vector.broadcast %116 : vector<8x1xf32> to vector<8x8xf32>
    %118 = arith.subf %114, %117 : vector<8x8xf32>
    %119 = math.exp %118 : vector<8x8xf32>
    %cst_42 = arith.constant dense<0.000000e+00> : vector<8xf32>
    %120 = vector.multi_reduction <add>, %119, %cst_42 [1] : vector<8x8xf32> to vector<8xf32>
    %121 = vector.shape_cast %120 : vector<8xf32> to vector<8x1xf32>
    %122 = tpu.reciprocal %121 {approx = true} : vector<8x1xf32> -> vector<8x1xf32>
    %123 = vector.broadcast %122 : vector<8x1xf32> to vector<8x8xf32>
    %124 = arith.mulf %119, %123 : vector<8x8xf32>
    %c1_43 = arith.constant 1 : index
    %c0_44 = arith.constant 0 : index
    %c0_45 = arith.constant 0 : index
    %c0_46 = arith.constant 0 : index
    %125 = vector.load %arg15[%c1_43, %c0_44, %c0_45, %c0_46] : memref<2x4x8x8xf32, #tpu.memory_space<vmem>>, vector<1x1x8x8xf32>
    %126 = vector.shape_cast %125 : vector<1x1x8x8xf32> to vector<8x8xf32>
    %127 = vector.shape_cast %124 : vector<8x8xf32> to vector<1x1x8x8xf32>
    tpu.vector_store %arg15[%c1_43, %c0_44, %c0_45, %c0_46], %127 {strides = array<i32>} : memref<2x4x8x8xf32, #tpu.memory_space<vmem>>, vector<1x1x8x8xf32>,
    %128 = arith.truncf %124 : vector<8x8xf32> to vector<8x8xbf16>
    %129 = arith.truncf %109 : vector<8x8xf32> to vector<8x8xbf16>
    %cst_47 = arith.constant dense<0.000000e+00> : vector<8x8xf32>
    %130 = tpu.matmul %128, %129, %cst_47 {dimension_numbers = #tpu.dot_dimension_numbers<[1], [0], [0], [1], [0, 0, 1, 1], [], []>} : vector<8x8xbf16>, vector<8x8xbf16>, vector<8x8xf32> -> vector<8x8xf32>
    %131 = vector.extract_strided_slice %106 {offsets = [0, 8], sizes = [8, 8], strides = [1, 1]} : vector<8x96xf32> to vector<8x8xf32>
    %132 = vector.extract_strided_slice %106 {offsets = [0, 40], sizes = [8, 8], strides = [1, 1]} : vector<8x96xf32> to vector<8x8xf32>
    %133 = vector.extract_strided_slice %106 {offsets = [0, 72], sizes = [8, 8], strides = [1, 1]} : vector<8x96xf32> to vector<8x8xf32>
    %134 = arith.truncf %131 : vector<8x8xf32> to vector<8x8xbf16>
    %135 = arith.truncf %132 : vector<8x8xf32> to vector<8x8xbf16>
    %cst_48 = arith.constant dense<0.000000e+00> : vector<8x8xf32>
    %136 = tpu.matmul %134, %135, %cst_48 {dimension_numbers = #tpu.dot_dimension_numbers<[1], [1], [0], [0], [0, 0, 1, 0], [], []>} : vector<8x8xbf16>, vector<8x8xbf16>, vector<8x8xf32> -> vector<8x8xf32>
    %cst_49 = arith.constant 0.353553385 : f32
    %137 = vector.broadcast %cst_49 : f32 to vector<8x8xf32>
    %138 = arith.mulf %136, %137 : vector<8x8xf32>
    %cst_50 = arith.constant dense<0xFF800000> : vector<8xf32>
    %139 = vector.multi_reduction <maximumf>, %138, %cst_50 [1] : vector<8x8xf32> to vector<8xf32>
    %140 = vector.shape_cast %139 : vector<8xf32> to vector<8x1xf32>
    %141 = vector.broadcast %140 : vector<8x1xf32> to vector<8x8xf32>
    %142 = arith.subf %138, %141 : vector<8x8xf32>
    %143 = math.exp %142 : vector<8x8xf32>
    %cst_51 = arith.constant dense<0.000000e+00> : vector<8xf32>
    %144 = vector.multi_reduction <add>, %143, %cst_51 [1] : vector<8x8xf32> to vector<8xf32>
    %145 = vector.shape_cast %144 : vector<8xf32> to vector<8x1xf32>
    %146 = tpu.reciprocal %145 {approx = true} : vector<8x1xf32> -> vector<8x1xf32>
    %147 = vector.broadcast %146 : vector<8x1xf32> to vector<8x8xf32>
    %148 = arith.mulf %143, %147 : vector<8x8xf32>
    %c1_52 = arith.constant 1 : index
    %c1_53 = arith.constant 1 : index
    %c0_54 = arith.constant 0 : index
    %c0_55 = arith.constant 0 : index
    %149 = vector.load %arg15[%c1_52, %c1_53, %c0_54, %c0_55] : memref<2x4x8x8xf32, #tpu.memory_space<vmem>>, vector<1x1x8x8xf32>
    %150 = vector.shape_cast %149 : vector<1x1x8x8xf32> to vector<8x8xf32>
    %151 = vector.shape_cast %148 : vector<8x8xf32> to vector<1x1x8x8xf32>
    tpu.vector_store %arg15[%c1_52, %c1_53, %c0_54, %c0_55], %151 {strides = array<i32>} : memref<2x4x8x8xf32, #tpu.memory_space<vmem>>, vector<1x1x8x8xf32>,
    %152 = arith.truncf %148 : vector<8x8xf32> to vector<8x8xbf16>
    %153 = arith.truncf %133 : vector<8x8xf32> to vector<8x8xbf16>
    %cst_56 = arith.constant dense<0.000000e+00> : vector<8x8xf32>
    %154 = tpu.matmul %152, %153, %cst_56 {dimension_numbers = #tpu.dot_dimension_numbers<[1], [0], [0], [1], [0, 0, 1, 1], [], []>} : vector<8x8xbf16>, vector<8x8xbf16>, vector<8x8xf32> -> vector<8x8xf32>
    %155 = vector.extract_strided_slice %106 {offsets = [0, 16], sizes = [8, 8], strides = [1, 1]} : vector<8x96xf32> to vector<8x8xf32>
    %156 = vector.extract_strided_slice %106 {offsets = [0, 48], sizes = [8, 8], strides = [1, 1]} : vector<8x96xf32> to vector<8x8xf32>
    %157 = vector.extract_strided_slice %106 {offsets = [0, 80], sizes = [8, 8], strides = [1, 1]} : vector<8x96xf32> to vector<8x8xf32>
    %158 = arith.truncf %155 : vector<8x8xf32> to vector<8x8xbf16>
    %159 = arith.truncf %156 : vector<8x8xf32> to vector<8x8xbf16>
    %cst_57 = arith.constant dense<0.000000e+00> : vector<8x8xf32>
    %160 = tpu.matmul %158, %159, %cst_57 {dimension_numbers = #tpu.dot_dimension_numbers<[1], [1], [0], [0], [0, 0, 1, 0], [], []>} : vector<8x8xbf16>, vector<8x8xbf16>, vector<8x8xf32> -> vector<8x8xf32>
    %cst_58 = arith.constant 0.353553385 : f32
    %161 = vector.broadcast %cst_58 : f32 to vector<8x8xf32>
    %162 = arith.mulf %160, %161 : vector<8x8xf32>
    %cst_59 = arith.constant dense<0xFF800000> : vector<8xf32>
    %163 = vector.multi_reduction <maximumf>, %162, %cst_59 [1] : vector<8x8xf32> to vector<8xf32>
    %164 = vector.shape_cast %163 : vector<8xf32> to vector<8x1xf32>
    %165 = vector.broadcast %164 : vector<8x1xf32> to vector<8x8xf32>
    %166 = arith.subf %162, %165 : vector<8x8xf32>
    %167 = math.exp %166 : vector<8x8xf32>
    %cst_60 = arith.constant dense<0.000000e+00> : vector<8xf32>
    %168 = vector.multi_reduction <add>, %167, %cst_60 [1] : vector<8x8xf32> to vector<8xf32>
    %169 = vector.shape_cast %168 : vector<8xf32> to vector<8x1xf32>
    %170 = tpu.reciprocal %169 {approx = true} : vector<8x1xf32> -> vector<8x1xf32>
    %171 = vector.broadcast %170 : vector<8x1xf32> to vector<8x8xf32>
    %172 = arith.mulf %167, %171 : vector<8x8xf32>
    %c1_61 = arith.constant 1 : index
    %c2_62 = arith.constant 2 : index
    %c0_63 = arith.constant 0 : index
    %c0_64 = arith.constant 0 : index
    %173 = vector.load %arg15[%c1_61, %c2_62, %c0_63, %c0_64] : memref<2x4x8x8xf32, #tpu.memory_space<vmem>>, vector<1x1x8x8xf32>
    %174 = vector.shape_cast %173 : vector<1x1x8x8xf32> to vector<8x8xf32>
    %175 = vector.shape_cast %172 : vector<8x8xf32> to vector<1x1x8x8xf32>
    tpu.vector_store %arg15[%c1_61, %c2_62, %c0_63, %c0_64], %175 {strides = array<i32>} : memref<2x4x8x8xf32, #tpu.memory_space<vmem>>, vector<1x1x8x8xf32>,
    %176 = arith.truncf %172 : vector<8x8xf32> to vector<8x8xbf16>
    %177 = arith.truncf %157 : vector<8x8xf32> to vector<8x8xbf16>
    %cst_65 = arith.constant dense<0.000000e+00> : vector<8x8xf32>
    %178 = tpu.matmul %176, %177, %cst_65 {dimension_numbers = #tpu.dot_dimension_numbers<[1], [0], [0], [1], [0, 0, 1, 1], [], []>} : vector<8x8xbf16>, vector<8x8xbf16>, vector<8x8xf32> -> vector<8x8xf32>
    %179 = vector.extract_strided_slice %106 {offsets = [0, 24], sizes = [8, 8], strides = [1, 1]} : vector<8x96xf32> to vector<8x8xf32>
    %180 = vector.extract_strided_slice %106 {offsets = [0, 56], sizes = [8, 8], strides = [1, 1]} : vector<8x96xf32> to vector<8x8xf32>
    %181 = vector.extract_strided_slice %106 {offsets = [0, 88], sizes = [8, 8], strides = [1, 1]} : vector<8x96xf32> to vector<8x8xf32>
    %182 = arith.truncf %179 : vector<8x8xf32> to vector<8x8xbf16>
    %183 = arith.truncf %180 : vector<8x8xf32> to vector<8x8xbf16>
    %cst_66 = arith.constant dense<0.000000e+00> : vector<8x8xf32>
    %184 = tpu.matmul %182, %183, %cst_66 {dimension_numbers = #tpu.dot_dimension_numbers<[1], [1], [0], [0], [0, 0, 1, 0], [], []>} : vector<8x8xbf16>, vector<8x8xbf16>, vector<8x8xf32> -> vector<8x8xf32>
    %cst_67 = arith.constant 0.353553385 : f32
    %185 = vector.broadcast %cst_67 : f32 to vector<8x8xf32>
    %186 = arith.mulf %184, %185 : vector<8x8xf32>
    %cst_68 = arith.constant dense<0xFF800000> : vector<8xf32>
    %187 = vector.multi_reduction <maximumf>, %186, %cst_68 [1] : vector<8x8xf32> to vector<8xf32>
    %188 = vector.shape_cast %187 : vector<8xf32> to vector<8x1xf32>
    %189 = vector.broadcast %188 : vector<8x1xf32> to vector<8x8xf32>
    %190 = arith.subf %186, %189 : vector<8x8xf32>
    %191 = math.exp %190 : vector<8x8xf32>
    %cst_69 = arith.constant dense<0.000000e+00> : vector<8xf32>
    %192 = vector.multi_reduction <add>, %191, %cst_69 [1] : vector<8x8xf32> to vector<8xf32>
    %193 = vector.shape_cast %192 : vector<8xf32> to vector<8x1xf32>
    %194 = tpu.reciprocal %193 {approx = true} : vector<8x1xf32> -> vector<8x1xf32>
    %195 = vector.broadcast %194 : vector<8x1xf32> to vector<8x8xf32>
    %196 = arith.mulf %191, %195 : vector<8x8xf32>
    %c1_70 = arith.constant 1 : index
    %c3_71 = arith.constant 3 : index
    %c0_72 = arith.constant 0 : index
    %c0_73 = arith.constant 0 : index
    %197 = vector.load %arg15[%c1_70, %c3_71, %c0_72, %c0_73] : memref<2x4x8x8xf32, #tpu.memory_space<vmem>>, vector<1x1x8x8xf32>
    %198 = vector.shape_cast %197 : vector<1x1x8x8xf32> to vector<8x8xf32>
    %199 = vector.shape_cast %196 : vector<8x8xf32> to vector<1x1x8x8xf32>
    tpu.vector_store %arg15[%c1_70, %c3_71, %c0_72, %c0_73], %199 {strides = array<i32>} : memref<2x4x8x8xf32, #tpu.memory_space<vmem>>, vector<1x1x8x8xf32>,
    %200 = arith.truncf %196 : vector<8x8xf32> to vector<8x8xbf16>
    %201 = arith.truncf %181 : vector<8x8xf32> to vector<8x8xbf16>
    %cst_74 = arith.constant dense<0.000000e+00> : vector<8x8xf32>
    %202 = tpu.matmul %200, %201, %cst_74 {dimension_numbers = #tpu.dot_dimension_numbers<[1], [0], [0], [1], [0, 0, 1, 1], [], []>} : vector<8x8xbf16>, vector<8x8xbf16>, vector<8x8xf32> -> vector<8x8xf32>
    %203 = tpu.concatenate %130, %154, %178, %202 in 1 : vector<8x8xf32>, vector<8x8xf32>, vector<8x8xf32>, vector<8x8xf32> -> vector<8x32xf32>
    %204 = tpu.concatenate %105, %203 in 0 : vector<8x32xf32>, vector<8x32xf32> -> vector<16x32xf32>
    %205 = arith.truncf %204 : vector<16x32xf32> to vector<16x32xbf16>
    %c0_75 = arith.constant 0 : index
    %c0_76 = arith.constant 0 : index
    %206 = vector.load %arg4[%c0_75, %c0_76] : memref<32x32xbf16, #tpu.memory_space<vmem>>, vector<32x32xbf16>
    %cst_77 = arith.constant dense<0.000000e+00> : vector<16x32xf32>
    %207 = tpu.matmul %205, %206, %cst_77 {dimension_numbers = #tpu.dot_dimension_numbers<[1], [0], [0], [1], [0, 0, 1, 1], [], []>} : vector<16x32xbf16>, vector<32x32xbf16>, vector<16x32xf32> -> vector<16x32xf32>
    %c0_78 = arith.constant 0 : index
    %c0_79 = arith.constant 0 : index
    %208 = vector.load %arg5[%c0_78, %c0_79] : memref<1x32xf32, #tpu.memory_space<vmem>>, vector<1x32xf32>
    %209 = vector.broadcast %208 : vector<1x32xf32> to vector<16x32xf32>
    %210 = arith.addf %207, %209 : vector<16x32xf32>
    %211 = arith.addf %1, %210 : vector<16x32xf32>
    %c0_80 = arith.constant 0 : index
    %c0_81 = arith.constant 0 : index
    %212 = vector.load %arg6[%c0_80, %c0_81] : memref<1x32xf32, #tpu.memory_space<vmem>>, vector<1x32xf32>
    %c0_82 = arith.constant 0 : index
    %c0_83 = arith.constant 0 : index
    %213 = vector.load %arg7[%c0_82, %c0_83] : memref<1x32xf32, #tpu.memory_space<vmem>>, vector<1x32xf32>
    %cst_84 = arith.constant dense<0.000000e+00> : vector<16xf32>
    %214 = vector.multi_reduction <add>, %211, %cst_84 [1] : vector<16x32xf32> to vector<16xf32>
    %215 = vector.shape_cast %214 : vector<16xf32> to vector<16x1xf32>
    %cst_85 = arith.constant 3.200000e+01 : f32
    %216 = vector.broadcast %cst_85 : f32 to vector<16x1xf32>
    %217 = arith.divf %215, %216 : vector<16x1xf32>
    %218 = vector.broadcast %217 : vector<16x1xf32> to vector<16x32xf32>
    %219 = arith.subf %211, %218 : vector<16x32xf32>
    %220 = arith.mulf %219, %219 : vector<16x32xf32>
    %cst_86 = arith.constant dense<0.000000e+00> : vector<16xf32>
    %221 = vector.multi_reduction <add>, %220, %cst_86 [1] : vector<16x32xf32> to vector<16xf32>
    %222 = vector.shape_cast %221 : vector<16xf32> to vector<16x1xf32>
    %cst_87 = arith.constant 3.200000e+01 : f32
    %223 = vector.broadcast %cst_87 : f32 to vector<16x1xf32>
    %224 = arith.divf %222, %223 : vector<16x1xf32>
    %225 = vector.broadcast %217 : vector<16x1xf32> to vector<16x32xf32>
    %226 = arith.subf %211, %225 : vector<16x32xf32>
    %cst_88 = arith.constant 9.99999974E-6 : f32
    %227 = vector.broadcast %cst_88 : f32 to vector<16x1xf32>
    %228 = arith.addf %224, %227 : vector<16x1xf32>
    %229 = math.rsqrt %228 : vector<16x1xf32>
    %230 = vector.broadcast %229 : vector<16x1xf32> to vector<16x32xf32>
    %231 = arith.mulf %226, %230 : vector<16x32xf32>
    %232 = vector.broadcast %212 : vector<1x32xf32> to vector<16x32xf32>
    %233 = arith.mulf %231, %232 : vector<16x32xf32>
    %234 = vector.broadcast %213 : vector<1x32xf32> to vector<16x32xf32>
    %235 = arith.addf %233, %234 : vector<16x32xf32>
    %236 = arith.truncf %235 : vector<16x32xf32> to vector<16x32xbf16>
    %c0_89 = arith.constant 0 : index
    %c0_90 = arith.constant 0 : index
    %237 = vector.load %arg8[%c0_89, %c0_90] : memref<32x64xbf16, #tpu.memory_space<vmem>>, vector<32x64xbf16>
    %cst_91 = arith.constant dense<0.000000e+00> : vector<16x64xf32>
    %238 = tpu.matmul %236, %237, %cst_91 {dimension_numbers = #tpu.dot_dimension_numbers<[1], [0], [0], [1], [0, 0, 1, 1], [], []>} : vector<16x32xbf16>, vector<32x64xbf16>, vector<16x64xf32> -> vector<16x64xf32>
    %c0_92 = arith.constant 0 : index
    %c0_93 = arith.constant 0 : index
    %239 = vector.load %arg9[%c0_92, %c0_93] : memref<1x64xf32, #tpu.memory_space<vmem>>, vector<1x64xf32>
    %240 = vector.broadcast %239 : vector<1x64xf32> to vector<16x64xf32>
    %241 = arith.addf %238, %240 : vector<16x64xf32>
    %cst_94 = arith.constant 0.000000e+00 : f32
    %242 = vector.broadcast %cst_94 : f32 to vector<16x64xf32>
    %243 = arith.maximumf %241, %242 : vector<16x64xf32>
    %244 = arith.truncf %243 : vector<16x64xf32> to vector<16x64xbf16>
    %c0_95 = arith.constant 0 : index
    %c0_96 = arith.constant 0 : index
    %245 = vector.load %arg10[%c0_95, %c0_96] : memref<64x32xbf16, #tpu.memory_space<vmem>>, vector<64x32xbf16>
    %cst_97 = arith.constant dense<0.000000e+00> : vector<16x32xf32>
    %246 = tpu.matmul %244, %245, %cst_97 {dimension_numbers = #tpu.dot_dimension_numbers<[1], [0], [0], [1], [0, 0, 1, 1], [], []>} : vector<16x64xbf16>, vector<64x32xbf16>, vector<16x32xf32> -> vector<16x32xf32>
    %c0_98 = arith.constant 0 : index
    %c0_99 = arith.constant 0 : index
    %247 = vector.load %arg11[%c0_98, %c0_99] : memref<1x32xf32, #tpu.memory_space<vmem>>, vector<1x32xf32>
    %248 = vector.broadcast %247 : vector<1x32xf32> to vector<16x32xf32>
    %249 = arith.addf %246, %248 : vector<16x32xf32>
    %250 = arith.addf %235, %249 : vector<16x32xf32>
    %c0_100 = arith.constant 0 : index
    %c0_101 = arith.constant 0 : index
    %251 = vector.load %arg12[%c0_100, %c0_101] : memref<1x32xf32, #tpu.memory_space<vmem>>, vector<1x32xf32>
    %c0_102 = arith.constant 0 : index
    %c0_103 = arith.constant 0 : index
    %252 = vector.load %arg13[%c0_102, %c0_103] : memref<1x32xf32, #tpu.memory_space<vmem>>, vector<1x32xf32>
    %cst_104 = arith.constant dense<0.000000e+00> : vector<16xf32>
    %253 = vector.multi_reduction <add>, %250, %cst_104 [1] : vector<16x32xf32> to vector<16xf32>
    %254 = vector.shape_cast %253 : vector<16xf32> to vector<16x1xf32>
    %cst_105 = arith.constant 3.200000e+01 : f32
    %255 = vector.broadcast %cst_105 : f32 to vector<16x1xf32>
    %256 = arith.divf %254, %255 : vector<16x1xf32>
    %257 = vector.broadcast %256 : vector<16x1xf32> to vector<16x32xf32>
    %258 = arith.subf %250, %257 : vector<16x32xf32>
    %259 = arith.mulf %258, %258 : vector<16x32xf32>
    %cst_106 = arith.constant dense<0.000000e+00> : vector<16xf32>
    %260 = vector.multi_reduction <add>, %259, %cst_106 [1] : vector<16x32xf32> to vector<16xf32>
    %261 = vector.shape_cast %260 : vector<16xf32> to vector<16x1xf32>
    %cst_107 = arith.constant 3.200000e+01 : f32
    %262 = vector.broadcast %cst_107 : f32 to vector<16x1xf32>
    %263 = arith.divf %261, %262 : vector<16x1xf32>
    %264 = vector.broadcast %256 : vector<16x1xf32> to vector<16x32xf32>
    %265 = arith.subf %250, %264 : vector<16x32xf32>
    %cst_108 = arith.constant 9.99999974E-6 : f32
    %266 = vector.broadcast %cst_108 : f32 to vector<16x1xf32>
    %267 = arith.addf %263, %266 : vector<16x1xf32>
    %268 = math.rsqrt %267 : vector<16x1xf32>
    %269 = vector.broadcast %268 : vector<16x1xf32> to vector<16x32xf32>
    %270 = arith.mulf %265, %269 : vector<16x32xf32>
    %271 = vector.broadcast %251 : vector<1x32xf32> to vector<16x32xf32>
    %272 = arith.mulf %270, %271 : vector<16x32xf32>
    %273 = vector.broadcast %252 : vector<1x32xf32> to vector<16x32xf32>
    %274 = arith.addf %272, %273 : vector<16x32xf32>
    %275 = vector.shape_cast %274 : vector<16x32xf32> to vector<2x8x32xf32>
    %c0_109 = arith.constant 0 : index
    %c0_110 = arith.constant 0 : index
    %c0_111 = arith.constant 0 : index
    %276 = vector.load %arg14[%c0_109, %c0_110, %c0_111] : memref<2x8x32xf32, #tpu.memory_space<vmem>>, vector<2x8x32xf32>
    tpu.vector_store %arg14[%c0_109, %c0_110, %c0_111], %275 {strides = array<i32>} : memref<2x8x32xf32, #tpu.memory_space<vmem>>, vector<2x8x32xf32>,
    return
  }
  func.func @transform_0(%arg0: i32) -> (i32, i32, i32) {
    %c0_i32 = arith.constant 0 : i32
    %c0_i32_0 = arith.constant 0 : i32
    %c0_i32_1 = arith.constant 0 : i32
    return %arg0, %c0_i32, %c0_i32_0 : i32, i32, i32
  }
  func.func @transform_1(%arg0: i32) -> (i32, i32) {
    %c0_i32 = arith.constant 0 : i32
    %c0_i32_0 = arith.constant 0 : i32
    %c0_i32_1 = arith.constant 0 : i32
    return %c0_i32, %c0_i32_0 : i32, i32
  }
  func.func @transform_2(%arg0: i32) -> (i32, i32) {
    %c0_i32 = arith.constant 0 : i32
    %c0_i32_0 = arith.constant 0 : i32
    %c0_i32_1 = arith.constant 0 : i32
    return %c0_i32, %c0_i32_0 : i32, i32
  }
  func.func @transform_3(%arg0: i32) -> (i32, i32) {
    %c0_i32 = arith.constant 0 : i32
    %c0_i32_0 = arith.constant 0 : i32
    %c0_i32_1 = arith.constant 0 : i32
    return %c0_i32, %c0_i32_0 : i32, i32
  }
  func.func @transform_4(%arg0: i32) -> (i32, i32) {
    %c0_i32 = arith.constant 0 : i32
    %c0_i32_0 = arith.constant 0 : i32
    %c0_i32_1 = arith.constant 0 : i32
    return %c0_i32, %c0_i32_0 : i32, i32
  }
  func.func @transform_5(%arg0: i32) -> (i32, i32) {
    %c0_i32 = arith.constant 0 : i32
    %c0_i32_0 = arith.constant 0 : i32
    %c0_i32_1 = arith.constant 0 : i32
    return %c0_i32, %c0_i32_0 : i32, i32
  }
  func.func @transform_6(%arg0: i32) -> (i32, i32) {
    %c0_i32 = arith.constant 0 : i32
    %c0_i32_0 = arith.constant 0 : i32
    %c0_i32_1 = arith.constant 0 : i32
    return %c0_i32, %c0_i32_0 : i32, i32
  }
  func.func @transform_7(%arg0: i32) -> (i32, i32) {
    %c0_i32 = arith.constant 0 : i32
    %c0_i32_0 = arith.constant 0 : i32
    %c0_i32_1 = arith.constant 0 : i32
    return %c0_i32, %c0_i32_0 : i32, i32
  }
  func.func @transform_8(%arg0: i32) -> (i32, i32) {
    %c0_i32 = arith.constant 0 : i32
    %c0_i32_0 = arith.constant 0 : i32
    %c0_i32_1 = arith.constant 0 : i32
    return %c0_i32, %c0_i32_0 : i32, i32
  }
  func.func @transform_9(%arg0: i32) -> (i32, i32) {
    %c0_i32 = arith.constant 0 : i32
    %c0_i32_0 = arith.constant 0 : i32
    %c0_i32_1 = arith.constant 0 : i32
    return %c0_i32, %c0_i32_0 : i32, i32
  }
  func.func @transform_10(%arg0: i32) -> (i32, i32) {
    %c0_i32 = arith.constant 0 : i32
    %c0_i32_0 = arith.constant 0 : i32
    %c0_i32_1 = arith.constant 0 : i32
    return %c0_i32, %c0_i32_0 : i32, i32
  }
  func.func @transform_11(%arg0: i32) -> (i32, i32) {
    %c0_i32 = arith.constant 0 : i32
    %c0_i32_0 = arith.constant 0 : i32
    %c0_i32_1 = arith.constant 0 : i32
    return %c0_i32, %c0_i32_0 : i32, i32
  }
  func.func @transform_12(%arg0: i32) -> (i32, i32) {
    %c0_i32 = arith.constant 0 : i32
    %c0_i32_0 = arith.constant 0 : i32
    %c0_i32_1 = arith.constant 0 : i32
    return %c0_i32, %c0_i32_0 : i32, i32
  }
  func.func @transform_13(%arg0: i32) -> (i32, i32, i32) {
    %c0_i32 = arith.constant 0 : i32
    %c0_i32_0 = arith.constant 0 : i32
    %c0_i32_1 = arith.constant 0 : i32
    return %arg0, %c0_i32, %c0_i32_0 : i32, i32, i32
  }
  func.func @transform_14(%arg0: i32) -> (i32, i32, i32, i32) {
    %c0_i32 = arith.constant 0 : i32
    %c0_i32_0 = arith.constant 0 : i32
    %c0_i32_1 = arith.constant 0 : i32
    %c0_i32_2 = arith.constant 0 : i32
    return %arg0, %c0_i32, %c0_i32_0, %c0_i32_1 : i32, i32, i32, i32
  }
}

</mosaic_0001>

<bundles_post_ra>
// kernel: encoder_layer_forward.1
= control target key start
LH: loop header
LB: loop body
LE: loop exit
PB: predicated region body
PF: predicated region fallthrough
CT: control target
= control target key end

     0   :  { %20 = vsyncpa [#allocation3], 0  ;;  %s2431_s0 = inlined_call_operand.vmem [shape: f32[2,8,32], index: 0, kind: input, shape index: {}]   ;;  %s2432_s1 = inlined_call_operand.vmem [shape: bf16[32,96], index: 1, kind: input, shape index: {}]   ;;  %s2433_s2 = inlined_call_operand.hbm [shape: f32[1,96], index: 2, kind: input, shape index: {}]   ;;  %s2434_s3 = inlined_call_operand.vmem [shape: bf16[32,32], index: 3, kind: input, shape index: {}]   ;;  %s2435_s4 = inlined_call_operand.hbm [shape: f32[1,32], index: 4, kind: input, shape index: {}]   ;;  %s2436_s5 = inlined_call_operand.hbm [shape: f32[1,32], index: 5, kind: input, shape index: {}]   ;;  %s2437_s6 = inlined_call_operand.hbm [shape: f32[1,32], index: 6, kind: input, shape index: {}]   ;;  %s2438_s7 = inlined_call_operand.vmem [shape: bf16[32,64], index: 7, kind: input, shape index: {}]   ;;  %s2439_s8 = inlined_call_operand.hbm [shape: f32[1,64], index: 8, kind: input, shape index: {}]   ;;  %s2440_s9 = inlined_call_operand.vmem [shape: bf16[64,32], index: 9, kind: input, shape index: {}]   ;;  %s2441_s10 = inlined_call_operand.hbm [shape: f32[1,32], index: 10, kind: input, shape index: {}]   ;;  %s2442_s11 = inlined_call_operand.hbm [shape: f32[1,32], index: 11, kind: input, shape index: {}]   ;;  %s2443_s12 = inlined_call_operand.hbm [shape: f32[1,32], index: 12, kind: input, shape index: {}]   ;;  %s2444_s13 = inlined_call_operand.hbm [shape: f32[2,8,32], index: 13, kind: output, shape index: {0}]   ;;  %s2445_s14 = inlined_call_operand.hbm [shape: f32[2,4,8,8], index: 14, kind: output, shape index: {1}]  }
   0x1   :  { %21 = vsyncpa [#allocation6], 0 }
   0x2   :  { %22 = vsyncpa [#allocation9], 0 }
   0x3   :  { %23 = vsyncpa [#allocation12], 0 }
   0x4   :  { %24 = vsyncpa [#allocation15], 0 }
   0x5   :  { %25 = vsyncpa [#allocation4], 0 }
   0x6   :  { %26 = vsyncpa [#allocation18], 0  ;;  %s2027_s29 = smov [#allocation5]   ;;  %s2028_s15 = smov [#allocation8]  }
   0x7   :  { %s49_s30 = sshll.u32 %s2027_s29, 4  ;;  %s69_s16 = sshll.u32 %s2028_s15, 4  ;;  %s50_s30 = int_to_ptr.vmem [resolvable:$true] %s49_s30  ;;  %s70_s16 = int_to_ptr.vmem [resolvable:$true] %s69_s16 }
   0x8   :  { %s1821_s17 = scalar_lea.vmem %s50_s30, 16  ;;  %s1825_s18 = scalar_lea.vmem %s50_s30, 32 }
   0x9   :  { %p1822_p0 = scmp.ne.s32.totalorder %s50_s30, %s1821_s17  ;;  %p1826_p1 = scmp.lt.s32.totalorder %s50_s30, %s50_s30 }
   0xa   :  { %p1827_p2 = scmp.lt.s32.totalorder %s1825_s18, %s1821_s17 }
   0xc   :  { %p1828_p3 = por %p1827_p2, %p1826_p1 }
   0xe   :  { %p1829_p4 = pnand %p1828_p3, %p1822_p0 }
  0x10   :  { %1832 = shalt.err (!%p1829_p4)
}
  0x11   :  { %52 = dma.hbm_to_vmem [thread:$0]  %s2435_s4, 16, %s50_s30, [#allocation6]  }
  0x12   :  { %s1841_s21 = scalar_lea.vmem %s70_s16, 16  ;;  %s1845_s22 = scalar_lea.vmem %s70_s16, 32 }
  0x13   :  { %p1842_p5 = scmp.ne.s32.totalorder %s70_s16, %s1841_s21  ;;  %p1846_p6 = scmp.lt.s32.totalorder %s70_s16, %s70_s16 }
  0x14   :  { %p1847_p7 = scmp.lt.s32.totalorder %s1845_s22, %s1841_s21 }
  0x16   :  { %p1848_p8 = por %p1847_p7, %p1846_p6 }
  0x18   :  { %p1849_p9 = pnand %p1848_p8, %p1842_p5 }
  0x1a   :  { %1852 = shalt.err (!%p1849_p9)
}
  0x1b   :  { %72 = dma.hbm_to_vmem [thread:$0]  %s2437_s6, 16, %s70_s16, [#allocation9]  }
  0x1c   :  { %s2029_s25 = smov [#allocation11]   ;;  %s2030_s27 = smov [#allocation2]  }
  0x1d   :  { %s93_s26 = sshll.u32 %s2029_s25, 4  ;;  %s37_s28 = sshll.u32 %s2030_s27, 4  ;;  %s94_s26 = int_to_ptr.vmem [resolvable:$true] %s93_s26  ;;  %s38_s28 = int_to_ptr.vmem [resolvable:$true] %s37_s28 }
  0x1e   :  { %s1861_s29 = scalar_lea.vmem %s94_s26, 16  ;;  %s1865_s4 = scalar_lea.vmem %s94_s26, 32 }
  0x1f   :  { %p1862_p10 = scmp.ne.s32.totalorder %s94_s26, %s1861_s29  ;;  %p1866_p11 = scmp.lt.s32.totalorder %s94_s26, %s94_s26 }
  0x20   :  { %p1867_p12 = scmp.lt.s32.totalorder %s1865_s4, %s1861_s29 }
  0x22   :  { %p1868_p13 = por %p1867_p12, %p1866_p11 }
  0x24   :  { %p1869_p0 = pnand %p1868_p13, %p1862_p10 }
  0x26   :  { %1872 = shalt.err (!%p1869_p0)
}
  0x27   :  { %96 = dma.hbm_to_vmem [thread:$0]  %s2441_s10, 16, %s94_s26, [#allocation12]  }
  0x28   :  { %s1881_s17 = scalar_lea.vmem %s38_s28, 16  ;;  %s1885_s6 = scalar_lea.vmem %s38_s28, 32 }
  0x29   :  { %p1882_p1 = scmp.ne.s32.totalorder %s38_s28, %s1881_s17  ;;  %p1886_p2 = scmp.lt.s32.totalorder %s38_s28, %s38_s28 }
  0x2a   :  { %p1887_p3 = scmp.lt.s32.totalorder %s1885_s6, %s1881_s17 }
  0x2c   :  { %p1888_p4 = por %p1887_p3, %p1886_p2 }
  0x2e   :  { %p1889_p5 = pnand %p1888_p4, %p1882_p1 }
  0x30   :  { %1892 = shalt.err (!%p1889_p5)
}
  0x31   :  { %40 = dma.hbm_to_vmem [thread:$0]  %s2433_s2, 16, %s38_s28, [#allocation3]  }
  0x32   :  { %s2031_s19 = smov [#allocation7]   ;;  %s2032_s21 = smov [#allocation10]  }
  0x33   :  { %s59_s20 = sshll.u32 %s2031_s19, 4  ;;  %s81_s22 = sshll.u32 %s2032_s21, 4  ;;  %s60_s20 = int_to_ptr.vmem [resolvable:$true] %s59_s20  ;;  %s82_s22 = int_to_ptr.vmem [resolvable:$true] %s81_s22 }
  0x34   :  { %s1901_s23 = scalar_lea.vmem %s60_s20, 16  ;;  %s1905_s10 = scalar_lea.vmem %s60_s20, 32 }
  0x35   :  { %p1902_p6 = scmp.ne.s32.totalorder %s60_s20, %s1901_s23  ;;  %p1906_p7 = scmp.lt.s32.totalorder %s60_s20, %s60_s20 }
  0x36   :  { %p1907_p8 = scmp.lt.s32.totalorder %s1905_s10, %s1901_s23 }
  0x38   :  { %p1908_p9 = por %p1907_p8, %p1906_p7 }
  0x3a   :  { %p1909_p10 = pnand %p1908_p9, %p1902_p6 }
  0x3c   :  { %1912 = shalt.err (!%p1909_p10)
}
  0x3d   :  { %62 = dma.hbm_to_vmem [thread:$0]  %s2436_s5, 16, %s60_s20, [#allocation6]  }
  0x3e   :  { %s1921_s26 = scalar_lea.vmem %s82_s22, 16  ;;  %s1925_s2 = scalar_lea.vmem %s82_s22, 32 }
  0x3f   :  { %p1922_p11 = scmp.ne.s32.totalorder %s82_s22, %s1921_s26  ;;  %p1926_p12 = scmp.lt.s32.totalorder %s82_s22, %s82_s22 }
  0x40   :  { %p1927_p13 = scmp.lt.s32.totalorder %s1925_s2, %s1921_s26 }
  0x42   :  { %p1928_p0 = por %p1927_p13, %p1926_p12 }
  0x44   :  { %p1929_p1 = pnand %p1928_p0, %p1922_p11 }
  0x46   :  { %1932 = shalt.err (!%p1929_p1)
}
  0x47   :  { %84 = dma.hbm_to_vmem [thread:$0]  %s2439_s8, 16, %s82_s22, [#allocation9]  }
  0x48   :  { %s2033_s29 = smov [#allocation13]   ;;  %s2034_s30 = smov [#allocation14]  }
  0x49   :  { %s103_s4 = sshll.u32 %s2033_s29, 4  ;;  %s113_s15 = sshll.u32 %s2034_s30, 4  ;;  %s104_s4 = int_to_ptr.vmem [resolvable:$true] %s103_s4  ;;  %s114_s15 = int_to_ptr.vmem [resolvable:$true] %s113_s15 }
  0x4a   :  { %s1941_s17 = scalar_lea.vmem %s104_s4, 16  ;;  %s1945_s5 = scalar_lea.vmem %s104_s4, 32 }
  0x4b   :  { %p1942_p2 = scmp.ne.s32.totalorder %s104_s4, %s1941_s17  ;;  %p1946_p3 = scmp.lt.s32.totalorder %s104_s4, %s104_s4 }
  0x4c   :  { %p1947_p4 = scmp.lt.s32.totalorder %s1945_s5, %s1941_s17 }
  0x4e   :  { %p1948_p5 = por %p1947_p4, %p1946_p3 }
  0x50   :  { %p1949_p6 = pnand %p1948_p5, %p1942_p2 }
  0x52   :  { %1952 = shalt.err (!%p1949_p6)
}
  0x53   :  { %106 = dma.hbm_to_vmem [thread:$0]  %s2442_s11, 16, %s104_s4, [#allocation12]  }
  0x54   :  { %s1961_s18 = scalar_lea.vmem %s114_s15, 16  ;;  %s1965_s8 = scalar_lea.vmem %s114_s15, 32 }
  0x55   :  { %p1962_p7 = scmp.ne.s32.totalorder %s114_s15, %s1961_s18  ;;  %p1966_p8 = scmp.lt.s32.totalorder %s114_s15, %s114_s15 }
  0x56   :  { %p1967_p9 = scmp.lt.s32.totalorder %s1965_s8, %s1961_s18 }
  0x58   :  { %p1968_p10 = por %p1967_p9, %p1966_p8 }
  0x5a   :  { %p1969_p11 = pnand %p1968_p10, %p1962_p7 }
  0x5c   :  { %1972 = shalt.err (!%p1969_p11)
}
  0x5d   :  { %116 = dma.hbm_to_vmem [thread:$0]  %s2443_s12, 16, %s114_s15, [#allocation15]  }
  0x5e   :  { %2013 = dma.done.wait [#allocation3], 16  }
  0x5f   :  { %2014 = vsyncadd [#allocation3], 4294967280 }
  0x60   :  { %2015 = dma.done.wait [#allocation6], 32  }
  0x61   :  { %2016 = vsyncadd [#allocation6], 4294967264 }
  0x62   :  { %2017 = dma.done.wait [#allocation9], 32  }
  0x63   :  { %2018 = vsyncadd [#allocation9], 4294967264 }
  0x64   :  { %2019 = dma.done.wait [#allocation12], 32  }
  0x65   :  { %2020 = vsyncadd [#allocation12], 4294967264 }
  0x66   :  { %2021 = dma.done.wait [#allocation15], 16  }
  0x67   :  { %2022 = vsyncadd [#allocation15], 4294967280  ;;  %v2035_v0 = vmov 0.0   ;;  %vm2036_vm0 = vmmov 0   ;;  %v1763_v1 = vld [vmem:[%s2432_s1 + $0x8] sm:$0xff]   ;;  %v1764_v2 = vld [vmem:[%s2432_s1] sm:$0xff]  }
  0x68   :  { %1589 = vmatprep.subr.bf16.mxu0 %v2035_v0  ;;  %1593 = vmatprep.mubr.msk.bf16.mxu0 %vm2036_vm0, %v2035_v0  ;;  %v2168_v3 = vld [vmem:[%s2431_s0] sm:$0xff]  ;;  %v2173_v4 = vld [vmem:[%s2431_s0 + $0x8] sm:$0xff]  ;;  %vm168_vm1 = vcmask 261120   ;;  %s2037_s0 = smov 120   ;;  %s2038_s1 = smov 96   ;;  %vm217_vm2 = vcmask 64512  }
  0x69   :  { %1597 = vmatprep.subr.bf16.mxu1 %v2035_v0  ;;  %1599 = vmatprep.mubr.msk.bf16.mxu1 %vm2036_vm0, %v2035_v0  ;;  %v144_v5 = vpack.c.bf16 %v2173_v4, %v2168_v3  ;;  %v1505_v6 = vld [vmem:[#allocation2] ss:$0 sm:$0xff]  ;;  %s2039_s26 = smov 80   ;;  %s2040_s2 = smov 88   ;;  %vm283_vm3 = vcmask 1043456   ;;  %vm679_vm4 = vcmask 130048  }
  0x6a   :  { %1590 = vmatpush3.bf16.msra.mxu0 %v1763_v1  ;;  %s2041_s27 = smov 72   ;;  %s2042_s28 = smov 112   ;;  %vm681_vm5 = vcmask 195584   ;;  %vm1375_vm6 = vcmask 523264  }
  0x6b   :  { %1591 = vmatprep.subr.bf16.mxu0 %v2035_v0  ;;  %s2043_s29 = smov 104   ;;  %s2044_s4 = smov 56  }
  0x6c   :  { %s2045_s30 = smov 64   ;;  %s2046_s15 = smov 48  }
  0x6d   :  { %s2047_s17 = smov 40   ;;  %s2048_s16 = smov 8  }
  0x6e   :  { %1592 = vmatpush3.bf16.msra.mxu0 %v1764_v2  ;;  %s2049_s19 = smov 16   ;;  %s2050_s20 = smov 24  }
  0x6f   :  { %1603 = vmatprep.subr.bf16.mxu0 %v2035_v0 }
  0x71   :  { %1594 = vmatmul.mubr.msk.bf16.vlgmr.msra.gmra.mxu0 %vm168_vm1, %v144_v5 }
  0x72   :  { %1605 = vmatprep.mubr.msk.bf16.mxu0 %vm2036_vm0, %v2035_v0 }
 0x131   :  { %v206_v7 = vpop.f32.mrf.mxu0 }
 0x132   :  { %v207_v8 = vadd.f32 %v1505_v6, %v206_v7 }
 0x133   :  { %v1595_v9 = vpop.f32.mrf.mxu0 }
 0x134   :  { %v2182_v10 = vpack.c.bf16 %v207_v8, %v207_v8 }
 0x135   :  { %v209_v11 = vpop.f32.mrf.mxu0 }
 0x136   :  { %327 = vrot.lane.b32.xlu1 %v2182_v10, %s2037_s0  ;;  %215 = vrot.lane.b32.xlu0 %v2182_v10, %s2038_s1  ;;  %v210_v13 = vadd.f32 %v1505_v6, %v209_v11 }
 0x137   :  { %v1596_v12 = vpop.f32.mrf.mxu0 }
 0x138   :  { %v2190_v14 = vpack.c.bf16 %v210_v13, %v210_v13 }
 0x13a   :  { %442 = vrot.lane.b32.xlu1 %v2182_v10, %s2039_s26  ;;  %329 = vrot.lane.b32.xlu0 %v2182_v10, %s2040_s2 }
 0x13e   :  { %555 = vrot.lane.b32.xlu1 %v2182_v10, %s2041_s27  ;;  %440 = vrot.lane.b32.xlu0 %v2182_v10, %s2042_s28 }
 0x142   :  { %553 = vrot.lane.b32.xlu0 %v2182_v10, %s2043_s29  ;;  %685 = vrot.lane.b32.xlu1 %v2190_v14, %s2038_s1 }
 0x146   :  { %798 = vrot.lane.b32.xlu0 %v2190_v14, %s2040_s2  ;;  %796 = vrot.lane.b32.xlu1 %v2190_v14, %s2037_s0 }
 0x14a   :  { %911 = vrot.lane.b32.xlu0 %v2190_v14, %s2039_s26  ;;  %909 = vrot.lane.b32.xlu1 %v2190_v14, %s2042_s28 }
 0x14e   :  { %1024 = vrot.lane.b32.xlu0 %v2190_v14, %s2041_s27  ;;  %1022 = vrot.lane.b32.xlu1 %v2190_v14, %s2043_s29 }
 0x1a8   :  { %v216_v15 = vpop.permute.xlu0 %215  ;;  %v328_v18 = vpop.permute.xlu1 %327 }
 0x1a9   :  { %v222_v16 = vsel %vm217_vm2, %v216_v15, 0 }
 0x1aa   :  { %1598 = vmatpush3.bf16.xpose.msra.mxu1 %v222_v16 }
 0x1ab   :  { %1609 = vmatprep.subr.bf16.mxu1 %v2035_v0 }
 0x1ac   :  { %v330_v17 = vpop.permute.xlu0 %329  ;;  %v443_v20 = vpop.permute.xlu1 %442 }
 0x1ad   :  { %v335_v19 = vsel %vm217_vm2, %v330_v17, 0  ;;  %v448_v21 = vsel %vm217_vm2, %v443_v20, 0 }
 0x1b0   :  { %v556_v22 = vpop.permute.xlu1 %555  ;;  %v441_v23 = vpop.permute.xlu0 %440 }
 0x1b1   :  { %1600 = vmatmul.mubr.msk.bf16.vlgmr.msra.gmra.mxu1 %vm217_vm2, %v2182_v10  ;;  %v561_v24 = vsel %vm217_vm2, %v556_v22, 0 }
 0x1b2   :  { %1610 = vmatpush3.bf16.xpose.msra.mxu1 %v335_v19  ;;  %1611 = vmatprep.mubr.msk.bf16.mxu1 %vm2036_vm0, %v2035_v0 }
 0x1b3   :  { %1621 = vmatprep.subr.bf16.mxu1 %v2035_v0 }
 0x1b4   :  { %v686_v25 = vpop.permute.xlu1 %685  ;;  %v554_v26 = vpop.permute.xlu0 %553 }
 0x1b5   :  { %v691_v27 = vsel %vm217_vm2, %v686_v25, 0 }
 0x1b8   :  { %v799_v28 = vpop.permute.xlu0 %798  ;;  %v797_v31 = vpop.permute.xlu1 %796 }
 0x1b9   :  { %1612 = vmatmul.mubr.msk.bf16.vlgmr.msra.gmra.mxu1 %vm217_vm2, %v328_v18  ;;  %v804_v29 = vsel %vm217_vm2, %v799_v28, 0 }
 0x1ba   :  { %1622 = vmatpush3.bf16.xpose.msra.mxu1 %v448_v21  ;;  %1623 = vmatprep.mubr.msk.bf16.mxu1 %vm2036_vm0, %v2035_v0 }
 0x1bb   :  { %1633 = vmatprep.subr.bf16.mxu1 %v2035_v0 }
 0x1bc   :  { %v912_v30 = vpop.permute.xlu0 %911  ;;  %v910_v34 = vpop.permute.xlu1 %909 }
 0x1bd   :  { %v917_v32 = vsel %vm217_vm2, %v912_v30, 0 }
 0x1c0   :  { %v1025_v33 = vpop.permute.xlu0 %1024  ;;  %v1023_v36 = vpop.permute.xlu1 %1022 }
 0x1c1   :  { %1624 = vmatmul.mubr.msk.bf16.vlgmr.msra.gmra.mxu1 %vm217_vm2, %v441_v23  ;;  %v1030_v35 = vsel %vm217_vm2, %v1025_v33, 0 }
 0x1c2   :  { %1634 = vmatpush3.bf16.xpose.msra.mxu1 %v561_v24  ;;  %1635 = vmatprep.mubr.msk.bf16.mxu1 %vm2036_vm0, %v2035_v0 }
 0x1c3   :  { %1645 = vmatprep.subr.bf16.mxu1 %v2035_v0 }
 0x1c9   :  { %1636 = vmatmul.mubr.msk.bf16.vlgmr.msra.gmra.mxu1 %vm217_vm2, %v554_v26 }
 0x1ca   :  { %1646 = vmatpush3.bf16.xpose.msra.mxu1 %v691_v27  ;;  %1647 = vmatprep.mubr.msk.bf16.mxu1 %vm2036_vm0, %v2035_v0 }
 0x1cb   :  { %1657 = vmatprep.subr.bf16.mxu1 %v2035_v0 }
 0x1d1   :  { %1648 = vmatmul.mubr.msk.bf16.vlgmr.msra.gmra.mxu1 %vm217_vm2, %v2190_v14 }
 0x1d2   :  { %1658 = vmatpush3.bf16.xpose.msra.mxu1 %v804_v29  ;;  %1659 = vmatprep.mubr.msk.bf16.mxu1 %vm2036_vm0, %v2035_v0 }
 0x1d3   :  { %1669 = vmatprep.subr.bf16.mxu1 %v2035_v0 }
 0x1d9   :  { %1660 = vmatmul.mubr.msk.bf16.vlgmr.msra.gmra.mxu1 %vm217_vm2, %v797_v31 }
 0x1da   :  { %1670 = vmatpush3.bf16.xpose.msra.mxu1 %v917_v32  ;;  %1671 = vmatprep.mubr.msk.bf16.mxu1 %vm2036_vm0, %v2035_v0 }
 0x1db   :  { %1681 = vmatprep.subr.bf16.mxu1 %v2035_v0 }
 0x1e1   :  { %1672 = vmatmul.mubr.msk.bf16.vlgmr.msra.gmra.mxu1 %vm217_vm2, %v910_v34 }
 0x1e2   :  { %1682 = vmatpush3.bf16.xpose.msra.mxu1 %v1030_v35  ;;  %1683 = vmatprep.mubr.msk.bf16.mxu1 %vm2036_vm0, %v2035_v0 }
 0x1e3   :  { %1693 = vmatprep.subr.bf16.mxu1 %v2035_v0 }
 0x1e9   :  { %1684 = vmatmul.mubr.msk.bf16.vlgmr.msra.gmra.mxu1 %vm217_vm2, %v1023_v36 }
 0x1ea   :  { %1697 = vmatprep.mubr.msk.bf16.mxu1 %vm2036_vm0, %v2035_v0 }
 0x271   :  { %v258_v37 = vpop.f32.mrf.mxu1 }
 0x272   :  { %v264_v38 = vmul.f32 0.35355338, %v258_v37 }
 0x273   :  { %v1601_v39 = vpop.f32.mrf.mxu1 }
 0x274   :  { %v265_v40 = vsel %vm217_vm2, %v264_v38, -inf }
 0x275   :  { %v261_v41 = vpop.f32.mrf.mxu1  ;;  %266 = vmax.xlane.f32.xlu0 %v265_v40 }
 0x277   :  { %v1602_v42 = vpop.f32.mrf.mxu1 }
 0x279   :  { %v371_v43 = vpop.f32.mrf.mxu1 }
 0x27a   :  { %v377_v44 = vmul.f32 0.35355338, %v371_v43 }
 0x27b   :  { %v1613_v45 = vpop.f32.mrf.mxu1 }
 0x27c   :  { %v378_v46 = vsel %vm217_vm2, %v377_v44, -inf }
 0x27d   :  { %v374_v47 = vpop.f32.mrf.mxu1  ;;  %379 = vmax.xlane.f32.xlu1 %v378_v46 }
 0x27f   :  { %v1614_v48 = vpop.f32.mrf.mxu1 }
 0x281   :  { %v484_v49 = vpop.f32.mrf.mxu1 }
 0x282   :  { %v490_v50 = vmul.f32 0.35355338, %v484_v49 }
 0x283   :  { %v1625_v51 = vpop.f32.mrf.mxu1 }
 0x284   :  { %v491_v52 = vsel %vm217_vm2, %v490_v50, -inf }
 0x285   :  { %v487_v53 = vpop.f32.mrf.mxu1  ;;  %492 = vmax.xlane.f32.xlu0 %v491_v52 }
 0x287   :  { %v1626_v54 = vpop.f32.mrf.mxu1 }
 0x289   :  { %v597_v55 = vpop.f32.mrf.mxu1 }
 0x28a   :  { %v2245_v56 = vmul.f32 0.35355338, %v597_v55 }
 0x28b   :  { %v1637_v57 = vpop.f32.mrf.mxu1 }
 0x28c   :  { %v604_v58 = vsel %vm217_vm2, %v2245_v56, -inf }
 0x28d   :  { %v600_v59 = vpop.f32.mrf.mxu1  ;;  %605 = vmax.xlane.f32.xlu0 %v604_v58 }
 0x28f   :  { %v1638_v60 = vpop.f32.mrf.mxu1 }
 0x291   :  { %v727_v61 = vpop.f32.mrf.mxu1 }
 0x292   :  { %v2249_v62 = vmul.f32 0.35355338, %v727_v61 }
 0x293   :  { %v1649_v63 = vpop.f32.mrf.mxu1 }
 0x294   :  { %v734_v1 = vsel %vm217_vm2, %v2249_v62, -inf }
 0x295   :  { %735 = vmax.xlane.f32.xlu1 %v734_v1  ;;  %v730_v2 = vpop.f32.mrf.mxu1 }
 0x297   :  { %v1650_v5 = vpop.f32.mrf.mxu1 }
 0x299   :  { %v840_v6 = vpop.f32.mrf.mxu1 }
 0x29a   :  { %v2253_v7 = vmul.f32 0.35355338, %v840_v6 }
 0x29b   :  { %v1661_v8 = vpop.f32.mrf.mxu1 }
 0x29c   :  { %v847_v9 = vsel %vm217_vm2, %v2253_v7, -inf }
 0x29d   :  { %848 = vmax.xlane.f32.xlu0 %v847_v9  ;;  %v843_v11 = vpop.f32.mrf.mxu1 }
 0x29f   :  { %v1662_v12 = vpop.f32.mrf.mxu1 }
 0x2a1   :  { %v953_v13 = vpop.f32.mrf.mxu1 }
 0x2a2   :  { %v959_v15 = vmul.f32 0.35355338, %v953_v13 }
 0x2a3   :  { %v1673_v16 = vpop.f32.mrf.mxu1 }
 0x2a4   :  { %v960_v17 = vsel %vm217_vm2, %v959_v15, -inf }
 0x2a5   :  { %961 = vmax.xlane.f32.xlu1 %v960_v17  ;;  %v956_v18 = vpop.f32.mrf.mxu1 }
 0x2a7   :  { %v1674_v19 = vpop.f32.mrf.mxu1 }
 0x2a9   :  { %v1066_v20 = vpop.f32.mrf.mxu1 }
 0x2aa   :  { %v2262_v24 = vmul.f32 0.35355338, %v1066_v20 }
 0x2ab   :  { %v1685_v21 = vpop.f32.mrf.mxu1 }
 0x2ac   :  { %v1073_v25 = vsel %vm217_vm2, %v2262_v24, -inf }
 0x2ad   :  { %v1069_v22 = vpop.f32.mrf.mxu1 }
 0x2af   :  { %v1686_v23 = vpop.f32.mrf.mxu1 }
 0x2b3   :  { %392 = vrot.lane.b32.xlu0 %v2182_v10, %s2044_s4 }
 0x2b6   :  { %278 = vrot.lane.b32.xlu1 %v2182_v10, %s2045_s30 }
 0x2d2   :  { %1074 = vmax.xlane.f32.xlu0 %v1073_v25 }
 0x2fe   :  { %v267_v26 = vpop.xlane.xlu0 %266 }
 0x2ff   :  { %v268_v27 = vsub.f32 %v264_v38, %v267_v26 }
 0x301   :  { %v269_v28 = vmul.f32 1.442695, %v268_v27 }
 0x303   :  { %1773 = vpow2.f32 %v269_v28 }
 0x306   :  { %v380_v29 = vpop.xlane.xlu1 %379 }
 0x307   :  { %v381_v30 = vsub.f32 %v377_v44, %v380_v29 }
 0x309   :  { %v382_v31 = vmul.f32 1.442695, %v381_v30 }
 0x30b   :  { %1775 = vpow2.f32 %v382_v31 }
 0x30e   :  { %v493_v32 = vpop.xlane.xlu0 %492 }
 0x30f   :  { %v494_v33 = vsub.f32 %v490_v50, %v493_v32 }
 0x310   :  { %v2266_v34 = vpop.eup %1773 }
 0x311   :  { %v495_v35 = vmul.f32 1.442695, %v494_v33  ;;  %v271_v36 = vsel %vm217_vm2, %v2266_v34, 0.0 }
 0x312   :  { %272 = vadd.xlane.f32.xlu1 %v271_v36 }
 0x313   :  { %1777 = vpow2.f32 %v495_v35 }
 0x316   :  { %v606_v44 = vpop.xlane.xlu0 %605 }
 0x317   :  { %v607_v46 = vsub.f32 %v2245_v56, %v606_v44 }
 0x318   :  { %v2270_v37 = vpop.eup %1775 }
 0x319   :  { %v384_v38 = vsel %vm217_vm2, %v2270_v37, 0.0  ;;  %v608_v47 = vmul.f32 1.442695, %v607_v46 }
 0x31a   :  { %385 = vadd.xlane.f32.xlu0 %v384_v38 }
 0x31b   :  { %1779 = vpow2.f32 %v608_v47 }
 0x31e   :  { %v736_v41 = vpop.xlane.xlu1 %735 }
 0x31f   :  { %v737_v48 = vsub.f32 %v2249_v62, %v736_v41 }
 0x320   :  { %v2274_v39 = vpop.eup %1777 }
 0x321   :  { %v497_v40 = vsel %vm217_vm2, %v2274_v39, 0.0  ;;  %v738_v51 = vmul.f32 1.442695, %v737_v48 }
 0x322   :  { %498 = vadd.xlane.f32.xlu1 %v497_v40 }
 0x323   :  { %1781 = vpow2.f32 %v738_v51 }
 0x326   :  { %v849_v49 = vpop.xlane.xlu0 %848 }
 0x327   :  { %v850_v50 = vsub.f32 %v2253_v7, %v849_v49 }
 0x329   :  { %v851_v53 = vmul.f32 1.442695, %v850_v50 }
 0x32a   :  { %v393_v62 = vpop.permute.xlu0 %392 }
 0x32b   :  { %1783 = vpow2.f32 %v851_v53 }
 0x32e   :  { %v962_v42 = vpop.xlane.xlu1 %961 }
 0x32f   :  { %v963_v52 = vsub.f32 %v959_v15, %v962_v42  ;;  %v398_v15 = vsel %vm283_vm3, %v393_v62, 0 }
 0x330   :  { %505 = vrot.lane.b32.xlu0 %v2182_v10, %s2046_s15 }
 0x331   :  { %v964_v54 = vmul.f32 1.442695, %v963_v52 }
 0x332   :  { %v279_v43 = vpop.permute.xlu1 %278 }
 0x333   :  { %v285_v45 = vsel %vm283_vm3, %v279_v43, 0  ;;  %618 = vrot.lane.b32.xlu1 %v2182_v10, %s2047_s17  ;;  %1785 = vpow2.f32 %v964_v54  ;;  %v2287_v10 = vpop.eup %1779 }
 0x334   :  { %1604 = vmatpush3.bf16.msra.mxu0 %v285_v45  ;;  %v610_v55 = vsel %vm217_vm2, %v2287_v10, 0.0  ;;  %v2291_v56 = vpop.eup %1781 }
 0x335   :  { %1615 = vmatprep.subr.bf16.mxu0 %v2035_v0  ;;  %v740_v58 = vsel %vm217_vm2, %v2291_v56, 0.0 }
 0x338   :  { %v2293_v57 = vpop.eup %1783 }
 0x339   :  { %v853_v60 = vsel %vm217_vm2, %v2293_v57, 0.0 }
 0x340   :  { %v2297_v59 = vpop.eup %1785 }
 0x341   :  { %v966_v61 = vsel %vm217_vm2, %v2297_v59, 0.0 }
 0x34f   :  { %611 = vadd.xlane.f32.xlu0 %v610_v55 }
 0x353   :  { %741 = vadd.xlane.f32.xlu0 %v740_v58 }
 0x357   :  { %854 = vadd.xlane.f32.xlu1 %v853_v60  ;;  %967 = vadd.xlane.f32.xlu0 %v966_v61 }
 0x35b   :  { %v1075_v63 = vpop.xlane.xlu0 %1074 }
 0x35c   :  { %v1076_v1 = vsub.f32 %v2262_v24, %v1075_v63 }
 0x35e   :  { %v1077_v2 = vmul.f32 1.442695, %v1076_v1 }
 0x360   :  { %1787 = vpow2.f32 %v1077_v2 }
 0x368   :  { %861 = vrot.lane.b32.xlu1 %v2190_v14, %s2044_s4 }
 0x36c   :  { %974 = vrot.lane.b32.xlu1 %v2190_v14, %s2046_s15 }
 0x36d   :  { %v2308_v5 = vpop.eup %1787 }
 0x36e   :  { %v1079_v6 = vsel %vm217_vm2, %v2308_v5, 0.0 }
 0x36f   :  { %1080 = vadd.xlane.f32.xlu0 %v1079_v6 }
 0x370   :  { %1087 = vrot.lane.b32.xlu1 %v2190_v14, %s2047_s17 }
 0x385   :  { %748 = vrot.lane.b32.xlu0 %v2190_v14, %s2045_s30 }
 0x39b   :  { %v273_v7 = vpop.xlane.xlu1 %272 }
 0x39c   :  { %1789 = vrcp.f32 %v273_v7 }
 0x3a3   :  { %v386_v8 = vpop.xlane.xlu0 %385 }
 0x3a4   :  { %1791 = vrcp.f32 %v386_v8 }
 0x3a7   :  { %v506_v17 = vpop.permute.xlu0 %505 }
 0x3a8   :  { %v511_v19 = vsel %vm283_vm3, %v506_v17, 0 }
 0x3a9   :  { %v1790_v9 = vpop.eup %1789 }
 0x3aa   :  { %v275_v11 = vmul.f32 %v1790_v9, %v2266_v34 }
 0x3ab   :  { %v499_v12 = vpop.xlane.xlu1 %498 }
 0x3ac   :  { %1793 = vrcp.f32 %v499_v12  ;;  %276 = vst.msk [vmem:[#allocation17] sm:$0xff] %vm217_vm2, %v275_v11  ;;  %v277_v13 = vpack.c.bf16 %v275_v11, %v275_v11 }
 0x3ae   :  { %1606 = vmatmul.mubr.msk.bf16.vlgmr.msra.gmra.mxu0 %vm217_vm2, %v277_v13  ;;  %v1765_v13 = vld [vmem:[%s2434_s3 + $0x8] sm:$0xff]  }
 0x3af   :  { %1616 = vmatpush3.bf16.msra.mxu0 %v398_v15  ;;  %1617 = vmatprep.mubr.msk.bf16.mxu0 %vm2036_vm0, %v2035_v0  ;;  %v619_v22 = vpop.permute.xlu1 %618 }
 0x3b0   :  { %1627 = vmatprep.subr.bf16.mxu0 %v2035_v0  ;;  %v624_v24 = vsel %vm283_vm3, %v619_v22, 0  ;;  %1694 = vmatpush3.bf16.msra.mxu1 %v1765_v13 }
 0x3b1   :  { %v1792_v14 = vpop.eup %1791  ;;  %1695 = vmatprep.subr.bf16.mxu1 %v2035_v0 }
 0x3b2   :  { %v388_v16 = vmul.f32 %v1792_v14, %v2270_v37 }
 0x3b4   :  { %390 = vst.msk [vmem:[#allocation17 + $0x8] sm:$0xff] %vm217_vm2, %v388_v16  ;;  %v391_v18 = vpack.c.bf16 %v388_v16, %v388_v16 }
 0x3b6   :  { %1618 = vmatmul.mubr.msk.bf16.vlgmr.msra.gmra.mxu0 %vm217_vm2, %v391_v18  ;;  %v1766_v18 = vld [vmem:[%s2434_s3] sm:$0xff]  }
 0x3b7   :  { %1628 = vmatpush3.bf16.msra.mxu0 %v511_v19  ;;  %1629 = vmatprep.mubr.msk.bf16.mxu0 %vm2036_vm0, %v2035_v0 }
 0x3b8   :  { %1639 = vmatprep.subr.bf16.mxu0 %v2035_v0  ;;  %1696 = vmatpush3.bf16.msra.mxu1 %v1766_v18  ;;  %v1530_v18 = vld [vmem:[#allocation8] ss:$0 sm:$0xff] }
 0x3b9   :  { %v1794_v20 = vpop.eup %1793  ;;  %1709 = vmatprep.subr.bf16.mxu1 %v2035_v0 }
 0x3ba   :  { %v501_v21 = vmul.f32 %v1794_v20, %v2274_v39 }
 0x3bc   :  { %503 = vst.msk [vmem:[#allocation17 + $0x10] sm:$0xff] %vm217_vm2, %v501_v21  ;;  %v504_v23 = vpack.c.bf16 %v501_v21, %v501_v21 }
 0x3be   :  { %1630 = vmatmul.mubr.msk.bf16.vlgmr.msra.gmra.mxu0 %vm217_vm2, %v504_v23 }
 0x3bf   :  { %1640 = vmatpush3.bf16.msra.mxu0 %v624_v24  ;;  %1641 = vmatprep.mubr.msk.bf16.mxu0 %vm2036_vm0, %v2035_v0 }
 0x3c0   :  { %1651 = vmatprep.subr.bf16.mxu0 %v2035_v0 }
 0x3d8   :  { %v612_v25 = vpop.xlane.xlu0 %611 }
 0x3d9   :  { %1795 = vrcp.f32 %v612_v25 }
 0x3dc   :  { %v742_v26 = vpop.xlane.xlu0 %741 }
 0x3dd   :  { %1797 = vrcp.f32 %v742_v26 }
 0x3e0   :  { %v968_v27 = vpop.xlane.xlu0 %967  ;;  %v855_v28 = vpop.xlane.xlu1 %854 }
 0x3e1   :  { %1799 = vrcp.f32 %v968_v27 }
 0x3e2   :  { %1801 = vrcp.f32 %v855_v28 }
 0x3e4   :  { %v862_v41 = vpop.permute.xlu1 %861 }
 0x3e5   :  { %v867_v43 = vsel %vm283_vm3, %v862_v41, 0 }
 0x3e6   :  { %v1796_v29 = vpop.eup %1795 }
 0x3e7   :  { %v614_v30 = vmul.f32 %v1796_v29, %v2287_v10 }
 0x3e8   :  { %v975_v45 = vpop.permute.xlu1 %974 }
 0x3e9   :  { %616 = vst.msk [vmem:[#allocation17 + $0x18] sm:$0xff] %vm217_vm2, %v614_v30  ;;  %v617_v31 = vpack.c.bf16 %v614_v30, %v614_v30  ;;  %v980_v48 = vsel %vm283_vm3, %v975_v45, 0  ;;  %v1525_v45 = vld [vmem:[#allocation5] ss:$0 sm:$0xff] }
 0x3ea   :  { %v1798_v32 = vpop.eup %1797 }
 0x3eb   :  { %1642 = vmatmul.mubr.msk.bf16.vlgmr.msra.gmra.mxu0 %vm217_vm2, %v617_v31  ;;  %v744_v33 = vmul.f32 %v1798_v32, %v2291_v56 }
 0x3ec   :  { %1653 = vmatprep.mubr.msk.bf16.mxu0 %vm2036_vm0, %v2035_v0  ;;  %v1088_v49 = vpop.permute.xlu1 %1087 }
 0x3ed   :  { %746 = vst.msk [vmem:[#allocation17 + $0x20] sm:$0xff] %vm217_vm2, %v744_v33  ;;  %v747_v42 = vpack.c.bf16 %v744_v33, %v744_v33  ;;  %v1093_v51 = vsel %vm283_vm3, %v1088_v49, 0 }
 0x3ee   :  { %v1800_v34 = vpop.eup %1799 }
 0x3ef   :  { %v1802_v35 = vpop.eup %1801  ;;  %v970_v36 = vmul.f32 %v1800_v34, %v2297_v59 }
 0x3f0   :  { %v857_v37 = vmul.f32 %v1802_v35, %v2293_v57 }
 0x3f1   :  { %972 = vst.msk [vmem:[#allocation17 + $0x30] sm:$0xff] %vm217_vm2, %v970_v36  ;;  %v973_v50 = vpack.c.bf16 %v970_v36, %v970_v36 }
 0x3f2   :  { %859 = vst.msk [vmem:[#allocation17 + $0x28] sm:$0xff] %vm217_vm2, %v857_v37  ;;  %v860_v46 = vpack.c.bf16 %v857_v37, %v857_v37 }
 0x3f8   :  { %v1081_v38 = vpop.xlane.xlu0 %1080 }
 0x3f9   :  { %1803 = vrcp.f32 %v1081_v38 }
 0x3fc   :  { %v749_v39 = vpop.permute.xlu0 %748 }
 0x3fd   :  { %v754_v40 = vsel %vm283_vm3, %v749_v39, 0 }
 0x3fe   :  { %1652 = vmatpush3.bf16.msra.mxu0 %v754_v40 }
 0x3ff   :  { %1663 = vmatprep.subr.bf16.mxu0 %v2035_v0 }
 0x401   :  { %1654 = vmatmul.mubr.msk.bf16.vlgmr.msra.gmra.mxu0 %vm217_vm2, %v747_v42 }
 0x402   :  { %1664 = vmatpush3.bf16.msra.mxu0 %v867_v43  ;;  %1665 = vmatprep.mubr.msk.bf16.mxu0 %vm2036_vm0, %v2035_v0 }
 0x403   :  { %1675 = vmatprep.subr.bf16.mxu0 %v2035_v0 }
 0x406   :  { %v1804_v44 = vpop.eup %1803 }
 0x407   :  { %v1083_v47 = vmul.f32 %v1804_v44, %v2308_v5 }
 0x409   :  { %1666 = vmatmul.mubr.msk.bf16.vlgmr.msra.gmra.mxu0 %vm217_vm2, %v860_v46  ;;  %1085 = vst.msk [vmem:[#allocation17 + $0x38] sm:$0xff] %vm217_vm2, %v1083_v47  ;;  %v1086_v52 = vpack.c.bf16 %v1083_v47, %v1083_v47 }
 0x40a   :  { %1676 = vmatpush3.bf16.msra.mxu0 %v980_v48  ;;  %1677 = vmatprep.mubr.msk.bf16.mxu0 %vm2036_vm0, %v2035_v0 }
 0x40b   :  { %1687 = vmatprep.subr.bf16.mxu0 %v2035_v0 }
 0x411   :  { %1678 = vmatmul.mubr.msk.bf16.vlgmr.msra.gmra.mxu0 %vm217_vm2, %v973_v50 }
 0x412   :  { %1688 = vmatpush3.bf16.msra.mxu0 %v1093_v51  ;;  %1689 = vmatprep.mubr.msk.bf16.mxu0 %vm2036_vm0, %v2035_v0 }
 0x413   :  { %1701 = vmatprep.subr.bf16.mxu0 %v2035_v0 }
 0x419   :  { %1690 = vmatmul.mubr.msk.bf16.vlgmr.msra.gmra.mxu0 %vm217_vm2, %v1086_v52 }
 0x41a   :  { %1705 = vmatprep.mubr.msk.bf16.mxu0 %vm2036_vm0, %v2035_v0 }
 0x46e   :  { %v321_v53 = vpop.f32.mrf.mxu0 }
 0x470   :  { %v1607_v54 = vpop.f32.mrf.mxu0 }
 0x472   :  { %v324_v10 = vpop.f32.mrf.mxu0 }
 0x474   :  { %v1608_v55 = vpop.f32.mrf.mxu0 }
 0x476   :  { %v434_v56 = vpop.f32.mrf.mxu0 }
 0x478   :  { %v1619_v57 = vpop.f32.mrf.mxu0 }
 0x47a   :  { %v437_v58 = vpop.f32.mrf.mxu0 }
 0x47c   :  { %v1620_v59 = vpop.f32.mrf.mxu0 }
 0x47e   :  { %v547_v60 = vpop.f32.mrf.mxu0 }
 0x480   :  { %v1631_v61 = vpop.f32.mrf.mxu0 }
 0x482   :  { %v550_v62 = vpop.f32.mrf.mxu0 }
 0x484   :  { %v1632_v63 = vpop.f32.mrf.mxu0 }
 0x4ab   :  { %v660_v1 = vpop.f32.mrf.mxu0 }
 0x4ad   :  { %v1643_v2 = vpop.f32.mrf.mxu0 }
 0x4ae   :  { %v1769_v2 = vld [vmem:[%s2440_s9 + $0x18] sm:$0xff]  }
 0x4af   :  { %v663_v5 = vpop.f32.mrf.mxu0 }
 0x4b1   :  { %v1644_v6 = vpop.f32.mrf.mxu0 }
 0x4c1   :  { %v790_v7 = vpop.f32.mrf.mxu0 }
 0x4c3   :  { %v1655_v8 = vpop.f32.mrf.mxu0 }
 0x4c5   :  { %v793_v9 = vpop.f32.mrf.mxu0 }
 0x4c7   :  { %v1656_v11 = vpop.f32.mrf.mxu0 }
 0x4c9   :  { %v903_v12 = vpop.f32.mrf.mxu0 }
 0x4ca   :  { %v1748_v15 = vpack.i.bf16 %v903_v12, %v434_v56 }
 0x4cb   :  { %v1667_v14 = vpop.f32.mrf.mxu0 }
 0x4cc   :  { %1749 = vrot.lane.b32.xlu1 %v1748_v15, %s2048_s16  ;;  %v1529_v15 = vld [vmem:[#allocation7] ss:$0 sm:$0xff] }
 0x4cd   :  { %v906_v16 = vpop.f32.mrf.mxu0 }
 0x4cf   :  { %v1668_v17 = vpop.f32.mrf.mxu0 }
 0x4d1   :  { %v1016_v19 = vpop.f32.mrf.mxu0 }
 0x4d2   :  { %v1753_v20 = vpack.i.bf16 %v1016_v19, %v547_v60 }
 0x4d3   :  { %v1679_v21 = vpop.f32.mrf.mxu0 }
 0x4d4   :  { %1754 = vrot.lane.b32.xlu1 %v1753_v20, %s2049_s19 }
 0x4d5   :  { %v1019_v22 = vpop.f32.mrf.mxu0 }
 0x4d7   :  { %v1680_v23 = vpop.f32.mrf.mxu0 }
 0x4d8   :  { %v1770_v23 = vld [vmem:[%s2440_s9 + $0x10] sm:$0xff]  }
 0x4d9   :  { %v1129_v24 = vpop.f32.mrf.mxu0 }
 0x4da   :  { %v1758_v25 = vpack.i.bf16 %v1129_v24, %v660_v1  ;;  %v1768_v1 = vld [vmem:[%s2438_s7] sm:$0xff]   ;;  %v1771_v24 = vld [vmem:[%s2440_s9 + $0x8] sm:$0xff]  }
 0x4db   :  { %v1691_v26 = vpop.f32.mrf.mxu0 }
 0x4dc   :  { %1759 = vrot.lane.b32.xlu0 %v1758_v25, %s2050_s20  ;;  %v1772_v25 = vld [vmem:[%s2440_s9] sm:$0xff]   ;;  %v1531_v26 = vld [vmem:[#allocation10] ss:$0 sm:$0xff]  ;;  %s2051_s9 = smov [#allocation17]  }
 0x4dd   :  { %v1132_v27 = vpop.f32.mrf.mxu0  ;;  %s1485_s26 = sshll.u32 %s2051_s9, 4  ;;  %s1486_s26 = int_to_ptr.vmem [resolvable:$true] %s1485_s26 }
 0x4de   :  { %s1973_s2 = scalar_lea.vmem %s1486_s26, 1024  ;;  %p1978_p13 = scmp.lt.s32.totalorder %s1486_s26, %s1486_s26 }
 0x4df   :  { %v1692_v28 = vpop.f32.mrf.mxu0  ;;  %p1974_p12 = scmp.ne.s32.totalorder %s1486_s26, %s1973_s2  ;;  %p1979_p0 = scmp.lt.s32.totalorder %s1973_s2, %s1973_s2 }
 0x4e1   :  { %p1980_p1 = por %p1979_p0, %p1978_p13 }
 0x4e3   :  { %p1981_p2 = pnand %p1980_p1, %p1974_p12 }
 0x53e   :  { %v1750_v29 = vpop.permute.xlu1 %1749 }
 0x53f   :  { %v1752_v31 = vunpack.i.h.bf16 %v1750_v29  ;;  %v1751_v32 = vunpack.i.l.bf16 %v1750_v29 }
 0x541   :  { %v1147_v36 = vsel %vm217_vm2, %v790_v7, %v1752_v31  ;;  %v678_v37 = vsel %vm217_vm2, %v321_v53, %v1751_v32 }
 0x546   :  { %v1755_v30 = vpop.permute.xlu1 %1754 }
 0x547   :  { %v1757_v33 = vunpack.i.h.bf16 %v1755_v30  ;;  %v1756_v34 = vunpack.i.l.bf16 %v1755_v30 }
 0x549   :  { %v1148_v40 = vsel %vm679_vm4, %v1147_v36, %v1757_v33  ;;  %v680_v41 = vsel %vm679_vm4, %v678_v37, %v1756_v34  ;;  %v1535_v36 = vld [vmem:[#allocation11] ss:$0 sm:$0xff] }
 0x54e   :  { %v1760_v35 = vpop.permute.xlu0 %1759 }
 0x54f   :  { %v1762_v38 = vunpack.i.h.bf16 %v1760_v35  ;;  %v1761_v39 = vunpack.i.l.bf16 %v1760_v35 }
 0x551   :  { %v1149_v42 = vsel %vm681_vm5, %v1148_v40, %v1762_v38  ;;  %v682_v43 = vsel %vm681_vm5, %v680_v41, %v1761_v39 }
 0x552   :  { %v1150_v44 = vpack.c.bf16 %v1149_v42, %v682_v43 }
 0x554   :  { %1698 = vmatmul.mubr.msk.bf16.vlgmr.msra.gmra.mxu1 %vm168_vm1, %v1150_v44 }
 0x555   :  { %1717 = vmatprep.mubr.msk.bf16.mxu1 %vm2036_vm0, %v2035_v0  ;;  %1710 = vmatpush3.bf16.msra.mxu1 %v1769_v2 }
 0x556   :  { %1711 = vmatprep.subr.bf16.mxu1 %v2035_v0 }
 0x559   :  { %1712 = vmatpush3.bf16.msra.mxu1 %v1770_v23 }
 0x55a   :  { %1713 = vmatprep.subr.bf16.mxu1 %v2035_v0 }
 0x55d   :  { %1714 = vmatpush3.bf16.msra.mxu1 %v1771_v24 }
 0x55e   :  { %1715 = vmatprep.subr.bf16.mxu1 %v2035_v0 }
 0x561   :  { %1716 = vmatpush3.bf16.msra.mxu1 %v1772_v25 }
 0x614   :  { %v1211_v46 = vpop.f32.mrf.mxu1 }
 0x615   :  { %v1212_v47 = vadd.f32 %v1525_v45, %v1211_v46 }
 0x616   :  { %v1699_v48 = vpop.f32.mrf.mxu1 }
 0x617   :  { %v1218_v49 = vadd.f32 %v1212_v47, %v2168_v3 }
 0x618   :  { %v1214_v50 = vpop.f32.mrf.mxu1 }
 0x619   :  { %v1215_v51 = vadd.f32 %v1525_v45, %v1214_v50  ;;  %v1222_v52 = vsel %vm168_vm1, %v1218_v49, 0.0 }
 0x61a   :  { %1223 = vadd.xlane.f32.xlu1 %v1222_v52  ;;  %v1700_v53 = vpop.f32.mrf.mxu1 }
 0x61b   :  { %v1219_v54 = vadd.f32 %v1215_v51, %v2173_v4  ;;  %v1767_v4 = vld [vmem:[%s2438_s7 + $0x8] sm:$0xff]  }
 0x61c   :  { %1702 = vmatpush3.bf16.msra.mxu0 %v1767_v4 }
 0x61d   :  { %v1225_v10 = vsel %vm168_vm1, %v1219_v54, 0.0  ;;  %1703 = vmatprep.subr.bf16.mxu0 %v2035_v0 }
 0x61e   :  { %1226 = vadd.xlane.f32.xlu0 %v1225_v10 }
 0x620   :  { %1704 = vmatpush3.bf16.msra.mxu0 %v1768_v1 }
 0x6a3   :  { %v1224_v55 = vpop.xlane.xlu1 %1223 }
 0x6a4   :  { %v1229_v56 = vmul.f32 0.03125, %v1224_v55 }
 0x6a6   :  { %v1231_v57 = vsub.f32 %v1218_v49, %v1229_v56 }
 0x6a7   :  { %v1227_v58 = vpop.xlane.xlu0 %1226 }
 0x6a8   :  { %v1230_v59 = vmul.f32 0.03125, %v1227_v58  ;;  %v1233_v60 = vmul.f32 %v1231_v57, %v1231_v57 }
 0x6aa   :  { %v1232_v61 = vsub.f32 %v1219_v54, %v1230_v59  ;;  %v1235_v3 = vsel %vm168_vm1, %v1233_v60, 0.0 }
 0x6ab   :  { %1236 = vadd.xlane.f32.xlu0 %v1235_v3 }
 0x6ac   :  { %v1234_v62 = vmul.f32 %v1232_v61, %v1232_v61 }
 0x6ae   :  { %v1238_v63 = vsel %vm168_vm1, %v1234_v62, 0.0 }
 0x6af   :  { %1239 = vadd.xlane.f32.xlu1 %v1238_v63 }
 0x734   :  { %v1237_v5 = vpop.xlane.xlu0 %1236 }
 0x735   :  { %v1241_v6 = vmul.f32 0.03125, %v1237_v5 }
 0x737   :  { %v1243_v7 = vadd.f32 1e-05, %v1241_v6 }
 0x738   :  { %v1240_v8 = vpop.xlane.xlu1 %1239 }
 0x739   :  { %1805 = vrsqrt.f32 %v1243_v7  ;;  %v1242_v9 = vmul.f32 0.03125, %v1240_v8 }
 0x73b   :  { %v1244_v11 = vadd.f32 1e-05, %v1242_v9 }
 0x73d   :  { %1807 = vrsqrt.f32 %v1244_v11 }
 0x746   :  { %v1806_v12 = vpop.eup %1805 }
 0x747   :  { %v1247_v13 = vmul.f32 %v1806_v12, %v1231_v57 }
 0x749   :  { %v1255_v17 = vmul.f32 %v1529_v15, %v1247_v13 }
 0x74a   :  { %v1808_v14 = vpop.eup %1807 }
 0x74b   :  { %v1248_v16 = vmul.f32 %v1808_v14, %v1232_v61  ;;  %v1263_v20 = vadd.f32 %v1530_v18, %v1255_v17 }
 0x74d   :  { %v1256_v19 = vmul.f32 %v1529_v15, %v1248_v16 }
 0x74f   :  { %v1264_v21 = vadd.f32 %v1530_v18, %v1256_v19 }
 0x751   :  { %v1265_v22 = vpack.c.bf16 %v1264_v21, %v1263_v20 }
 0x753   :  { %1706 = vmatmul.mubr.msk.bf16.vlgmr.msra.gmra.mxu0 %vm168_vm1, %v1265_v22 }
 0x813   :  { %v1326_v27 = vpop.f32.mrf.mxu0 }
 0x814   :  { %v1327_v29 = vadd.f32 %v1531_v26, %v1326_v27 }
 0x815   :  { %v1707_v28 = vpop.f32.mrf.mxu0 }
 0x816   :  { %v1333_v33 = vmax.f32 %v1327_v29, 0.0 }
 0x817   :  { %v1329_v30 = vpop.f32.mrf.mxu0 }
 0x818   :  { %v1330_v31 = vadd.f32 %v1531_v26, %v1329_v30 }
 0x819   :  { %v1708_v32 = vpop.f32.mrf.mxu0 }
 0x81a   :  { %v1334_v34 = vmax.f32 %v1330_v31, 0.0 }
 0x81c   :  { %v1335_v35 = vpack.c.bf16 %v1334_v34, %v1333_v33 }
 0x81e   :  { %1718 = vmatmul.mubr.msk.bf16.vlgmr.msra.gmra.mxu1 %vm1375_vm6, %v1335_v35 }
 0x8de   :  { %v1413_v37 = vpop.f32.mrf.mxu1 }
 0x8df   :  { %v1414_v0 = vadd.f32 %v1535_v36, %v1413_v37 }
 0x8e0   :  { %v1719_v38 = vpop.f32.mrf.mxu1 }
 0x8e1   :  { %v1420_v39 = vadd.f32 %v1414_v0, %v1263_v20 }
 0x8e2   :  { %v1416_v40 = vpop.f32.mrf.mxu1 }
 0x8e3   :  { %v1417_v41 = vadd.f32 %v1535_v36, %v1416_v40  ;;  %v1424_v42 = vsel %vm168_vm1, %v1420_v39, 0.0 }
 0x8e4   :  { %1425 = vadd.xlane.f32.xlu0 %v1424_v42  ;;  %v1720_v43 = vpop.f32.mrf.mxu1 }
 0x8e5   :  { %v1421_v44 = vadd.f32 %v1417_v41, %v1264_v21 }
 0x8e7   :  { %v1427_v45 = vsel %vm168_vm1, %v1421_v44, 0.0 }
 0x8e8   :  { %1428 = vadd.xlane.f32.xlu1 %v1427_v45 }
 0x96d   :  { %v1426_v46 = vpop.xlane.xlu0 %1425 }
 0x96e   :  { %v1430_v47 = vmul.f32 0.03125, %v1426_v46 }
 0x970   :  { %v1432_v48 = vsub.f32 %v1420_v39, %v1430_v47 }
 0x971   :  { %v1429_v49 = vpop.xlane.xlu1 %1428 }
 0x972   :  { %v1431_v50 = vmul.f32 0.03125, %v1429_v49  ;;  %v1434_v51 = vmul.f32 %v1432_v48, %v1432_v48 }
 0x974   :  { %v1433_v52 = vsub.f32 %v1421_v44, %v1431_v50  ;;  %v1436_v53 = vsel %vm168_vm1, %v1434_v51, 0.0 }
 0x975   :  { %1437 = vadd.xlane.f32.xlu0 %v1436_v53 }
 0x976   :  { %v1435_v54 = vmul.f32 %v1433_v52, %v1433_v52 }
 0x978   :  { %v1439_v10 = vsel %vm168_vm1, %v1435_v54, 0.0 }
 0x979   :  { %1440 = vadd.xlane.f32.xlu1 %v1439_v10 }
 0x97a   :  { %1984 = shalt.err (!%p1981_p2)
}
 0x97b   :  { %s2052_s27 = smov 128   ;;  %v1541_v3 = vld [vmem:[#allocation13] ss:$0 sm:$0xff]  ;;  %v1542_v63 = vld [vmem:[#allocation14] ss:$0 sm:$0xff]  ;;  %s2053_s4 = smov [#allocation16]  }
 0x97c   :  { %1491 = dma.vmem_to_hbm [thread:$0]  %s1486_s26, 1024, %s2445_s14, [#allocation18], %s2052_s27, %s2052_s27, %s2048_s16  }
 0x97d   :  { %s1473_s30 = sshll.u32 %s2053_s4, 4  ;;  %s1474_s30 = int_to_ptr.vmem [resolvable:$true] %s1473_s30 }
 0x97e   :  { %s1993_s14 = scalar_lea.vmem %s1474_s30, 256  ;;  %p1998_p4 = scmp.lt.s32.totalorder %s1474_s30, %s1474_s30 }
 0x97f   :  { %p1994_p3 = scmp.ne.s32.totalorder %s1474_s30, %s1993_s14  ;;  %p1999_p5 = scmp.lt.s32.totalorder %s1993_s14, %s1993_s14 }
 0x981   :  { %p2000_p6 = por %p1999_p5, %p1998_p4 }
 0x983   :  { %p2001_p7 = pnand %p2000_p6, %p1994_p3 }
 0x9fe   :  { %v1438_v55 = vpop.xlane.xlu0 %1437 }
 0x9ff   :  { %v1442_v56 = vmul.f32 0.03125, %v1438_v55 }
 0xa01   :  { %v1444_v57 = vadd.f32 1e-05, %v1442_v56 }
 0xa02   :  { %v1441_v58 = vpop.xlane.xlu1 %1440 }
 0xa03   :  { %1809 = vrsqrt.f32 %v1444_v57  ;;  %v1443_v59 = vmul.f32 0.03125, %v1441_v58 }
 0xa05   :  { %v1445_v60 = vadd.f32 1e-05, %v1443_v59 }
 0xa07   :  { %1811 = vrsqrt.f32 %v1445_v60 }
 0xa10   :  { %v1810_v61 = vpop.eup %1809 }
 0xa11   :  { %v1448_v62 = vmul.f32 %v1810_v61, %v1432_v48 }
 0xa13   :  { %v1456_v4 = vmul.f32 %v1541_v3, %v1448_v62 }
 0xa14   :  { %v1812_v1 = vpop.eup %1811 }
 0xa15   :  { %v1449_v2 = vmul.f32 %v1812_v1, %v1433_v52  ;;  %v1464_v5 = vadd.f32 %v1542_v63, %v1456_v4 }
 0xa17   :  { %v1457_v6 = vmul.f32 %v1541_v3, %v1449_v2  ;;  %1466 = vst.msk [vmem:[#allocation16] sm:$0xff] %vm168_vm1, %v1464_v5 }
 0xa19   :  { %v1465_v7 = vadd.f32 %v1542_v63, %v1457_v6 }
 0xa1b   :  { %1467 = vst.msk [vmem:[#allocation16 + $0x8] sm:$0xff] %vm168_vm1, %v1465_v7 }
 0xa1c   :  { %2004 = shalt.err (!%p2001_p7)
}
 0xa1d   :  { %1479 = dma.vmem_to_hbm [thread:$0]  %s1474_s30, 256, %s2444_s13, [#allocation4], %s2052_s27, %s2052_s27, %s2048_s16  }
 0xa1e   :  { %2023 = dma.done.wait [#allocation4], 256  }
 0xa1f   :  { %2024 = vsyncadd [#allocation4], 4294967040 }
 0xa20   :  { %2025 = dma.done.wait [#allocation18], 1024  }
 0xa21   :  { %2026 = vsyncadd [#allocation18], 4294966272 }
 0xa22   :  { %1498 = vsyncpa [#allocation3], 1 }
 0xa23   :  { %1499 = vsyncpa [#allocation6], 1 }
 0xa24   :  { %1500 = vsyncpa [#allocation9], 1 }
 0xa25   :  { %1501 = vsyncpa [#allocation12], 1 }
 0xa26   :  { %1502 = vsyncpa [#allocation15], 1 }
 0xa27   :  { %1503 = vsyncpa [#allocation4], 1 }
 0xa28   :  { %1504 = vsyncpa [#allocation18], 1 }

</bundles_post_ra>
